<compile_context>
chip_gen: v6e
topology: v6e:2x2x1
jax: 0.10.0
libtpu: 0.0.40
codegen_flags: <defaults>
</compile_context>

<pallas_src>
import functools

import numpy as np

import jax
import jax.numpy as jnp
from jax.experimental import pallas as pl
from jax.experimental.pallas import tpu as pltpu

_EPS = 1e-5
_VMEM_LIMIT = 32 * 1024 * 1024  # plenty for these tiles, safe on v5e/v6e/v7x


def _round_up(x, m):
    return ((x + m - 1) // m) * m


# ----------------------------------------------------------------------------
# Pallas kernels
# ----------------------------------------------------------------------------
def _conv1_fused_kernel(stride, out_hw, n_phases,
                        s1_ref, b1_ref, s2_ref, b2_ref, m_ref, *refs):
    """h2 = relu(bn2(conv3x3_stride(relu(bn1(x)), w1))) for one image.

    refs = (*phase_refs, w_ref, o_ref).  phase_refs[p] holds the zero-padded
    input, phase-split by `stride`, so tap (kh, kw) is a contiguous slice.
    """
    s = stride
    ho, wo = out_hw
    m = ho * wo
    phase_refs = refs[:n_phases]
    w_ref = refs[n_phases]
    o_ref = refs[n_phases + 1]
    cin_p = phase_refs[0].shape[-1]
    cout_p = w_ref.shape[-1]

    s1 = s1_ref[...]  # (1, cin_p) f32
    b1 = b1_ref[...]  # (1, cin_p) f32

    acc = jnp.zeros((m, cout_p), jnp.float32)
    for kh in range(3):
        for kw in range(3):
            t = kh * 3 + kw
            ph = (kh % s) * s + (kw % s)
            a, b = kh // s, kw // s
            xs = phase_refs[ph][0, a:a + ho, b:b + wo, :]
            xs = xs.reshape(m, cin_p).astype(jnp.float32)
            # BN1 + ReLU prologue.  The conv's zero-padding ring must stay 0
            # after BN+ReLU (bn(0) != 0), so the BN shift is masked per tap;
            # xs itself is already 0 on the ring.
            h = jnp.maximum(xs * s1 + b1 * m_ref[t], 0.0)
            acc = acc + jnp.dot(h.astype(w_ref.dtype), w_ref[t],
                                preferred_element_type=jnp.float32)

    # BN2 + ReLU epilogue (dropout p=0 / eval mode -> identity), f32 math.
    h2 = jnp.maximum(acc * s2_ref[...] + b2_ref[...], 0.0)
    o_ref[0] = h2.astype(o_ref.dtype)


def _conv2_fused_id_kernel(out_hw, s1_ref, b1_ref, hp_ref, w_ref, xsc_ref, o_ref):
    """out = conv3x3_1(h2, w2) + relu(bn1(x))   (identity-shortcut variant)."""
    ho, wo = out_hw
    m = ho * wo
    c_p = w_ref.shape[-1]

    # Shortcut branch: identity on the preprocessed input == relu(bn1(x)),
    # recomputed in-kernel (free VPU work under the MXU, no eye() matmul,
    # no extra HBM pass for h).
    xsc = xsc_ref[0].astype(jnp.float32)
    acc = jnp.maximum(xsc * s1_ref[...] + b1_ref[...], 0.0)

    for kh in range(3):
        for kw in range(3):
            t = hp_ref[0, kh:kh + ho, kw:kw + wo, :].reshape(m, c_p)
            acc = acc + jnp.dot(t, w_ref[kh * 3 + kw],
                                preferred_element_type=jnp.float32)
    o_ref[0] = acc.astype(o_ref.dtype)


def _conv2_fused_sc_kernel(out_hw, hp_ref, w_ref, xsc_ref, wsc_ref, o_ref):
    """out = conv3x3_1(h2, w2) + conv1x1_stride(x, ws)   (conv-shortcut variant)."""
    ho, wo = out_hw
    m = ho * wo
    c_p = w_ref.shape[-1]

    # Shortcut branch: 1x1 stride-s conv on the raw input (subsampled in JAX).
    acc = jnp.dot(xsc_ref[0], wsc_ref[...], preferred_element_type=jnp.float32)

    for kh in range(3):
        for kw in range(3):
            t = hp_ref[0, kh:kh + ho, kw:kw + wo, :].reshape(m, c_p)
            acc = acc + jnp.dot(t, w_ref[kh * 3 + kw],
                                preferred_element_type=jnp.float32)
    o_ref[0] = acc.astype(o_ref.dtype)


# ----------------------------------------------------------------------------
# pallas_call wrappers
# ----------------------------------------------------------------------------
def _compiler_params():
    return pltpu.CompilerParams(
        dimension_semantics=("parallel",),  # batch grid -> megacore on v7x
        vmem_limit_bytes=_VMEM_LIMIT,
    )


def conv1_fused_pallas(phases, w1, s1, b1, s2, b2, masks, *, stride, out_hw,
                       out_dtype):
    n_ph = len(phases)
    n, hc, wc, cin_p = phases[0].shape
    cout_p = w1.shape[-1]
    ho, wo = out_hw
    m = ho * wo

    kernel = functools.partial(_conv1_fused_kernel, stride, out_hw, n_ph)

    in_specs = (
        [pl.BlockSpec((1, cin_p), lambda i: (0, 0)),
         pl.BlockSpec((1, cin_p), lambda i: (0, 0)),
         pl.BlockSpec((1, cout_p), lambda i: (0, 0)),
         pl.BlockSpec((1, cout_p), lambda i: (0, 0)),
         pl.BlockSpec((9, m, 1), lambda i: (0, 0, 0))]
        + [pl.BlockSpec((1, hc, wc, cin_p), lambda i: (i, 0, 0, 0))] * n_ph
        + [pl.BlockSpec((9, cin_p, cout_p), lambda i: (0, 0, 0))]
    )
    return pl.pallas_call(
        kernel,
        out_shape=jax.ShapeDtypeStruct((n, m, cout_p), out_dtype),
        grid=(n,),
        in_specs=in_specs,
        out_specs=pl.BlockSpec((1, m, cout_p), lambda i: (i, 0, 0)),
        compiler_params=_compiler_params(),
    )(s1, b1, s2, b2, masks, *phases, w1)


def conv2_id_pallas(h2_pad, w2, xsc, s1, b1, *, out_hw):
    n, hp, wp, c_p = h2_pad.shape
    ho, wo = out_hw
    m = ho * wo
    kernel = functools.partial(_conv2_fused_id_kernel, out_hw)
    return pl.pallas_call(
        kernel,
        out_shape=jax.ShapeDtypeStruct((n, m, c_p), jnp.float32),
        grid=(n,),
        in_specs=[
            pl.BlockSpec((1, c_p), lambda i: (0, 0)),
            pl.BlockSpec((1, c_p), lambda i: (0, 0)),
            pl.BlockSpec((1, hp, wp, c_p), lambda i: (i, 0, 0, 0)),
            pl.BlockSpec((9, c_p, c_p), lambda i: (0, 0, 0)),
            pl.BlockSpec((1, m, c_p), lambda i: (i, 0, 0)),
        ],
        out_specs=pl.BlockSpec((1, m, c_p), lambda i: (i, 0, 0)),
        compiler_params=_compiler_params(),
    )(s1, b1, h2_pad, w2, xsc)


def conv2_sc_pallas(h2_pad, w2, xsc, ws, *, out_hw):
    n, hp, wp, cout_p = h2_pad.shape
    cin_p = xsc.shape[-1]
    ho, wo = out_hw
    m = ho * wo
    kernel = functools.partial(_conv2_fused_sc_kernel, out_hw)
    return pl.pallas_call(
        kernel,
        out_shape=jax.ShapeDtypeStruct((n, m, cout_p), jnp.float32),
        grid=(n,),
        in_specs=[
            pl.BlockSpec((1, hp, wp, cout_p), lambda i: (i, 0, 0, 0)),
            pl.BlockSpec((9, cout_p, cout_p), lambda i: (0, 0, 0)),
            pl.BlockSpec((1, m, cin_p), lambda i: (i, 0, 0)),
            pl.BlockSpec((cin_p, cout_p), lambda i: (0, 0)),
        ],
        out_specs=pl.BlockSpec((1, m, cout_p), lambda i: (i, 0, 0)),
        compiler_params=_compiler_params(),
    )(h2_pad, w2, xsc, ws)


# ----------------------------------------------------------------------------
# JAX glue: layout plumbing, BN folding, phase split, tap masks
# ----------------------------------------------------------------------------
def _pad_channels_nhwc(x, cp):
    c = x.shape[-1]
    if c == cp:
        return x
    return jnp.pad(x, ((0, 0), (0, 0), (0, 0), (0, cp - c)))


def _fold_bn(bn, cp):
    gamma, beta, mean, var = bn
    scale = gamma / jnp.sqrt(var + _EPS)
    shift = beta - mean * scale
    c = gamma.shape[0]
    scale = jnp.pad(scale, (0, cp - c)).reshape(1, cp).astype(jnp.float32)
    shift = jnp.pad(shift, (0, cp - c)).reshape(1, cp).astype(jnp.float32)
    return scale, shift


def _prep_w3x3(w, cin_p, cout_p, dtype):
    """(Cout, Cin, 3, 3) -> (9, Cin_p, Cout_p), tap index t = kh*3 + kw."""
    co, ci, kh, kw = w.shape
    wm = jnp.transpose(w, (2, 3, 1, 0)).reshape(kh * kw, ci, co)
    wm = jnp.pad(wm, ((0, 0), (0, cin_p - ci), (0, cout_p - co)))
    return wm.astype(dtype)


def _prep_w1x1(w, cin_p, cout_p, dtype):
    co, ci, _, _ = w.shape
    wm = jnp.transpose(w, (2, 3, 1, 0)).reshape(ci, co)
    wm = jnp.pad(wm, ((0, cin_p - ci), (0, cout_p - co)))
    return wm.astype(dtype)


def _pad_and_phase_split(x_nhwc, stride, out_hw):
    """Zero-pad spatially by 1, then split into stride*stride phase arrays so
    every 3x3 tap becomes a contiguous static slice inside the kernel.

    Total extra HBM traffic is ~1x the activation (vs. 9x for im2col)."""
    s = stride
    ho, wo = out_hw
    hc = ho + 2 // s
    wc = wo + 2 // s
    xp = jnp.pad(x_nhwc, ((0, 0), (1, 1), (1, 1), (0, 0)))
    eh = max(0, s * hc - xp.shape[1])
    ew = max(0, s * wc - xp.shape[2])
    if eh or ew:  # only needed for odd sizes; the extra rows are never read
        xp = jnp.pad(xp, ((0, 0), (0, eh), (0, ew), (0, 0)))
    phases = []
    for ph in range(s):
        for pw in range(s):
            phases.append(xp[:, ph::s, pw::s, :][:, :hc, :wc, :])
    return phases


def _tap_masks(stride, hw, out_hw):
    """(9, Ho*Wo, 1) f32: 1 where tap (kh, kw) reads a real pixel, 0 where it
    falls on the conv's zero-padding ring (BN shift is masked with this)."""
    h, w = hw
    ho, wo = out_hw
    s = stride
    m = np.zeros((9, ho * wo, 1), np.float32)
    for kh in range(3):
        for kw in range(3):
            rin = kh + s * np.arange(ho)[:, None]   # padded-row coordinate
            cin = kw + s * np.arange(wo)[None, :]   # padded-col coordinate
            valid = (rin >= 1) & (rin <= h) & (cin >= 1) & (cin <= w)
            m[kh * 3 + kw, :, 0] = valid.reshape(-1).astype(np.float32)
    return jnp.asarray(m)


def wrn_basic_block(x_nchw, params, stride, compute_dtype=jnp.bfloat16):
    """Forward pass of WRNBasicBlock (eval mode). x_nchw: (N, Cin, H, W) f32."""
    in_c = x_nchw.shape[1]
    out_c = params["w1"].shape[0]
    no_shortcut = (in_c == out_c) and (stride == 1)
    n, _, h, w = x_nchw.shape
    s = stride
    ho = (h - 1) // s + 1
    wo = (w - 1) // s + 1
    cin_p = _round_up(in_c, 128)
    cout_p = _round_up(out_c, 128)

    # NCHW -> NHWC, channels padded to a multiple of 128 (lane-dense), bf16.
    x = jnp.transpose(x_nchw, (0, 2, 3, 1))
    xq = _pad_channels_nhwc(x, cin_p).astype(compute_dtype)

    s1, b1 = _fold_bn(params["bn1"], cin_p)
    s2, b2 = _fold_bn(params["bn2"], cout_p)
    w1 = _prep_w3x3(params["w1"], cin_p, cout_p, compute_dtype)
    w2 = _prep_w3x3(params["w2"], cout_p, cout_p, compute_dtype)

    # --- kernel 1: h2 = relu(bn2(conv3x3_stride(relu(bn1(x)), w1))) ---------
    phases = _pad_and_phase_split(xq, s, (ho, wo))
    masks = _tap_masks(s, (h, w), (ho, wo))
    h2 = conv1_fused_pallas(phases, w1, s1, b1, s2, b2, masks,
                            stride=s, out_hw=(ho, wo), out_dtype=compute_dtype)

    # --- kernel 2: out = conv3x3_1(h2, w2) + shortcut ------------------------
    h2_pad = jnp.pad(h2.reshape(n, ho, wo, cout_p),
                     ((0, 0), (1, 1), (1, 1), (0, 0)))
    if no_shortcut:
        # shortcut == relu(bn1(x)); recomputed in-kernel from x (no eye matmul)
        xsc = xq.reshape(n, h * w, cin_p)
        out = conv2_id_pallas(h2_pad, w2, xsc, s1, b1, out_hw=(ho, wo))
    else:
        # shortcut == 1x1 stride-s conv on the raw input
        ws = _prep_w1x1(params["ws"], cin_p, cout_p, compute_dtype)
        xsc = xq[:, ::s, ::s, :].reshape(n, ho * wo, cin_p)
        out = conv2_sc_pallas(h2_pad, w2, xsc, ws, out_hw=(ho, wo))

    out = out.reshape(n, ho, wo, cout_p)[..., :out_c]
    return jnp.transpose(out, (0, 3, 1, 2)).astype(x_nchw.dtype)


# ----------------------------------------------------------------------------
# Deterministic parameter construction + pure-JAX reference
# ----------------------------------------------------------------------------
def make_params(key, in_c, out_c, stride):
    ks = jax.random.split(key, 12)
    no_shortcut = (in_c == out_c) and (stride == 1)

    def bn(kg, kb, km, kv, c):
        gamma = jax.random.uniform(kg, (c,), jnp.float32, 0.5, 1.5)
        beta = 0.1 * jax.random.normal(kb, (c,), jnp.float32)
        mean = 0.1 * jax.random.normal(km, (c,), jnp.float32)
        var = jax.random.uniform(kv, (c,), jnp.float32, 0.5, 1.5)
        return (gamma, beta, mean, var)

    params = {
        "bn1": bn(ks[0], ks[1], ks[2], ks[3], in_c),
        "w1": 0.1 * jax.random.normal(ks[4], (out_c, in_c, 3, 3), jnp.float32),
        "bn2": bn(ks[5], ks[6], ks[7], ks[8], out_c),
        "w2": 0.1 * jax.random.normal(ks[9], (out_c, out_c, 3, 3), jnp.float32),
    }
    if not no_shortcut:
        params["ws"] = 0.1 * jax.random.normal(ks[10], (out_c, in_c, 1, 1), jnp.float32)
    return params


def reference_block(x_nchw, params, stride):
    def bn(x, p):
        g, b, m, v = (a[None, :, None, None] for a in p)
        return (x - m) / jnp.sqrt(v + _EPS) * g + b

    def conv(x, w, s, pad):
        return jax.lax.conv_general_dilated(
            x, w, (s, s), [(pad, pad), (pad, pad)],
            dimension_numbers=("NCHW", "OIHW", "NCHW"),
        )

    in_c = x_nchw.shape[1]
    out_c = params["w1"].shape[0]
    no_shortcut = (in_c == out_c) and (stride == 1)

    h = jax.nn.relu(bn(x_nchw, params["bn1"]))
    y = conv(h, params["w1"], stride, 1)
    y = jax.nn.relu(bn(y, params["bn2"]))
    y = conv(y, params["w2"], 1, 1)
    sc = h if no_shortcut else conv(x_nchw, params["ws"], stride, 0)
    return y + sc


# ----------------------------------------------------------------------------
if __name__ == "__main__":
    key = jax.random.PRNGKey(0)
    kx, kp1, kp2 = jax.random.split(key, 3)

    x = jax.random.normal(kx, (2, 4, 16, 16), jnp.float32)

    # Case A: in=4, out=8, stride=2  (1x1-conv shortcut path)
    params_a = make_params(kp1, 4, 8, 2)
    ref_a = reference_block(x, params_a, 2)

    # Case B: in=4, out=4, stride=1  (identity shortcut path)
    params_b = make_params(kp2, 4, 4, 1)
    ref_b = reference_block(x, params_b, 1)

    # f32 compute path: tight structural check of the fused kernels.
    out_a32 = jax.block_until_ready(wrn_basic_block(x, params_a, 2, jnp.float32))
    out_b32 = jax.block_until_ready(wrn_basic_block(x, params_b, 1, jnp.float32))
    assert out_a32.shape == (2, 8, 8, 8)
    assert out_b32.shape == (2, 4, 16, 16)
    assert jnp.allclose(out_a32, ref_a, atol=5e-3, rtol=5e-3)
    assert jnp.allclose(out_b32, ref_b, atol=5e-3, rtol=5e-3)

    # bf16 compute path (the performance configuration): looser tolerance.
    out_a = jax.block_until_ready(wrn_basic_block(x, params_a, 2))
    out_b = jax.block_until_ready(wrn_basic_block(x, params_b, 1))
    assert out_a.shape == (2, 8, 8, 8)
    assert out_b.shape == (2, 4, 16, 16)
    assert jnp.allclose(out_a, ref_a, atol=2e-1, rtol=5e-2)
    assert jnp.allclose(out_b, ref_b, atol=2e-1, rtol=5e-2)

    print("KERNEL_OK")
</pallas_src>

<mosaic_0001>
module attributes {stable_mosaic.version = 11 : i64} {
  func.func @_conv1_fused_kernel(%arg0: i32, %arg1: memref<1x128xf32, #tpu.memory_space<vmem>>, %arg2: memref<1x128xf32, #tpu.memory_space<vmem>>, %arg3: memref<1x128xf32, #tpu.memory_space<vmem>>, %arg4: memref<1x128xf32, #tpu.memory_space<vmem>>, %arg5: memref<9x64x1xf32, #tpu.memory_space<vmem>>, %arg6: memref<1x9x9x128xf32, #tpu.memory_space<vmem>>, %arg7: memref<1x9x9x128xf32, #tpu.memory_space<vmem>>, %arg8: memref<1x9x9x128xf32, #tpu.memory_space<vmem>>, %arg9: memref<1x9x9x128xf32, #tpu.memory_space<vmem>>, %arg10: memref<9x128x128xf32, #tpu.memory_space<vmem>>, %arg11: memref<1x64x128xf32, #tpu.memory_space<vmem>>) attributes {dimension_semantics = [#tpu.dimension_semantics<parallel>], iteration_bounds = array<i64: 2>, scalar_prefetch = 0 : i64, scratch_operands = 0 : i64, tpu.core_type = #tpu.core_type<tc>, window_params = [{pipeline_mode = #tpu.pipeline_mode<synchronous>, transform_indices = @transform_0, window_bounds = array<i64: 1, 128>}, {pipeline_mode = #tpu.pipeline_mode<synchronous>, transform_indices = @transform_1, window_bounds = array<i64: 1, 128>}, {pipeline_mode = #tpu.pipeline_mode<synchronous>, transform_indices = @transform_2, window_bounds = array<i64: 1, 128>}, {pipeline_mode = #tpu.pipeline_mode<synchronous>, transform_indices = @transform_3, window_bounds = array<i64: 1, 128>}, {pipeline_mode = #tpu.pipeline_mode<synchronous>, transform_indices = @transform_4, window_bounds = array<i64: 9, 64, 1>}, {transform_indices = @transform_5, window_bounds = array<i64: 1, 9, 9, 128>}, {transform_indices = @transform_6, window_bounds = array<i64: 1, 9, 9, 128>}, {transform_indices = @transform_7, window_bounds = array<i64: 1, 9, 9, 128>}, {transform_indices = @transform_8, window_bounds = array<i64: 1, 9, 9, 128>}, {pipeline_mode = #tpu.pipeline_mode<synchronous>, transform_indices = @transform_9, window_bounds = array<i64: 9, 128, 128>}, {transform_indices = @transform_10, window_bounds = array<i64: 1, 64, 128>}]} {
    %c0 = arith.constant 0 : index
    %c0_0 = arith.constant 0 : index
    %0 = vector.load %arg1[%c0, %c0_0] : memref<1x128xf32, #tpu.memory_space<vmem>>, vector<1x128xf32>
    %c0_1 = arith.constant 0 : index
    %c0_2 = arith.constant 0 : index
    %1 = vector.load %arg2[%c0_1, %c0_2] : memref<1x128xf32, #tpu.memory_space<vmem>>, vector<1x128xf32>
    %cst = arith.constant 0.000000e+00 : f32
    %2 = vector.broadcast %cst : f32 to vector<64x128xf32>
    %c0_3 = arith.constant 0 : index
    %c0_4 = arith.constant 0 : index
    %c0_5 = arith.constant 0 : index
    %c0_6 = arith.constant 0 : index
    %3 = vector.load %arg6[%c0_3, %c0_4, %c0_5, %c0_6] : memref<1x9x9x128xf32, #tpu.memory_space<vmem>>, vector<1x8x8x128xf32>
    %4 = vector.shape_cast %3 : vector<1x8x8x128xf32> to vector<8x8x128xf32>
    %5 = vector.shape_cast %4 : vector<8x8x128xf32> to vector<64x128xf32>
    %6 = vector.broadcast %0 : vector<1x128xf32> to vector<64x128xf32>
    %7 = arith.mulf %5, %6 : vector<64x128xf32>
    %c0_7 = arith.constant 0 : index
    %c0_8 = arith.constant 0 : index
    %c0_9 = arith.constant 0 : index
    %8 = vector.load %arg5[%c0_7, %c0_8, %c0_9] : memref<9x64x1xf32, #tpu.memory_space<vmem>>, vector<1x64x1xf32>
    %9 = vector.shape_cast %8 : vector<1x64x1xf32> to vector<64x1xf32>
    %10 = vector.broadcast %1 : vector<1x128xf32> to vector<64x128xf32>
    %11 = vector.broadcast %9 : vector<64x1xf32> to vector<64x128xf32>
    %12 = arith.mulf %10, %11 : vector<64x128xf32>
    %13 = arith.addf %7, %12 : vector<64x128xf32>
    %cst_10 = arith.constant 0.000000e+00 : f32
    %14 = vector.broadcast %cst_10 : f32 to vector<64x128xf32>
    %15 = arith.maximumf %13, %14 : vector<64x128xf32>
    %c0_11 = arith.constant 0 : index
    %c0_12 = arith.constant 0 : index
    %c0_13 = arith.constant 0 : index
    %16 = vector.load %arg10[%c0_11, %c0_12, %c0_13] : memref<9x128x128xf32, #tpu.memory_space<vmem>>, vector<1x128x128xf32>
    %17 = vector.shape_cast %16 : vector<1x128x128xf32> to vector<128x128xf32>
    %cst_14 = arith.constant dense<0.000000e+00> : vector<64x128xf32>
    %18 = tpu.matmul %15, %17, %cst_14 {dimension_numbers = #tpu.dot_dimension_numbers<[1], [0], [0], [1], [0, 0, 1, 1], [], []>} : vector<64x128xf32>, vector<128x128xf32>, vector<64x128xf32> -> vector<64x128xf32>
    %19 = arith.addf %2, %18 : vector<64x128xf32>
    %c0_15 = arith.constant 0 : index
    %c0_16 = arith.constant 0 : index
    %c0_17 = arith.constant 0 : index
    %c0_18 = arith.constant 0 : index
    %20 = vector.load %arg7[%c0_15, %c0_16, %c0_17, %c0_18] : memref<1x9x9x128xf32, #tpu.memory_space<vmem>>, vector<1x8x8x128xf32>
    %21 = vector.shape_cast %20 : vector<1x8x8x128xf32> to vector<8x8x128xf32>
    %22 = vector.shape_cast %21 : vector<8x8x128xf32> to vector<64x128xf32>
    %23 = vector.broadcast %0 : vector<1x128xf32> to vector<64x128xf32>
    %24 = arith.mulf %22, %23 : vector<64x128xf32>
    %c1 = arith.constant 1 : index
    %c0_19 = arith.constant 0 : index
    %c0_20 = arith.constant 0 : index
    %25 = vector.load %arg5[%c1, %c0_19, %c0_20] : memref<9x64x1xf32, #tpu.memory_space<vmem>>, vector<1x64x1xf32>
    %26 = vector.shape_cast %25 : vector<1x64x1xf32> to vector<64x1xf32>
    %27 = vector.broadcast %1 : vector<1x128xf32> to vector<64x128xf32>
    %28 = vector.broadcast %26 : vector<64x1xf32> to vector<64x128xf32>
    %29 = arith.mulf %27, %28 : vector<64x128xf32>
    %30 = arith.addf %24, %29 : vector<64x128xf32>
    %cst_21 = arith.constant 0.000000e+00 : f32
    %31 = vector.broadcast %cst_21 : f32 to vector<64x128xf32>
    %32 = arith.maximumf %30, %31 : vector<64x128xf32>
    %c1_22 = arith.constant 1 : index
    %c0_23 = arith.constant 0 : index
    %c0_24 = arith.constant 0 : index
    %33 = vector.load %arg10[%c1_22, %c0_23, %c0_24] : memref<9x128x128xf32, #tpu.memory_space<vmem>>, vector<1x128x128xf32>
    %34 = vector.shape_cast %33 : vector<1x128x128xf32> to vector<128x128xf32>
    %cst_25 = arith.constant dense<0.000000e+00> : vector<64x128xf32>
    %35 = tpu.matmul %32, %34, %cst_25 {dimension_numbers = #tpu.dot_dimension_numbers<[1], [0], [0], [1], [0, 0, 1, 1], [], []>} : vector<64x128xf32>, vector<128x128xf32>, vector<64x128xf32> -> vector<64x128xf32>
    %36 = arith.addf %19, %35 : vector<64x128xf32>
    %c0_26 = arith.constant 0 : index
    %c0_27 = arith.constant 0 : index
    %c1_28 = arith.constant 1 : index
    %c0_29 = arith.constant 0 : index
    %37 = vector.load %arg6[%c0_26, %c0_27, %c1_28, %c0_29] : memref<1x9x9x128xf32, #tpu.memory_space<vmem>>, vector<1x8x8x128xf32>
    %38 = vector.shape_cast %37 : vector<1x8x8x128xf32> to vector<8x8x128xf32>
    %39 = vector.shape_cast %38 : vector<8x8x128xf32> to vector<64x128xf32>
    %40 = vector.broadcast %0 : vector<1x128xf32> to vector<64x128xf32>
    %41 = arith.mulf %39, %40 : vector<64x128xf32>
    %c2 = arith.constant 2 : index
    %c0_30 = arith.constant 0 : index
    %c0_31 = arith.constant 0 : index
    %42 = vector.load %arg5[%c2, %c0_30, %c0_31] : memref<9x64x1xf32, #tpu.memory_space<vmem>>, vector<1x64x1xf32>
    %43 = vector.shape_cast %42 : vector<1x64x1xf32> to vector<64x1xf32>
    %44 = vector.broadcast %1 : vector<1x128xf32> to vector<64x128xf32>
    %45 = vector.broadcast %43 : vector<64x1xf32> to vector<64x128xf32>
    %46 = arith.mulf %44, %45 : vector<64x128xf32>
    %47 = arith.addf %41, %46 : vector<64x128xf32>
    %cst_32 = arith.constant 0.000000e+00 : f32
    %48 = vector.broadcast %cst_32 : f32 to vector<64x128xf32>
    %49 = arith.maximumf %47, %48 : vector<64x128xf32>
    %c2_33 = arith.constant 2 : index
    %c0_34 = arith.constant 0 : index
    %c0_35 = arith.constant 0 : index
    %50 = vector.load %arg10[%c2_33, %c0_34, %c0_35] : memref<9x128x128xf32, #tpu.memory_space<vmem>>, vector<1x128x128xf32>
    %51 = vector.shape_cast %50 : vector<1x128x128xf32> to vector<128x128xf32>
    %cst_36 = arith.constant dense<0.000000e+00> : vector<64x128xf32>
    %52 = tpu.matmul %49, %51, %cst_36 {dimension_numbers = #tpu.dot_dimension_numbers<[1], [0], [0], [1], [0, 0, 1, 1], [], []>} : vector<64x128xf32>, vector<128x128xf32>, vector<64x128xf32> -> vector<64x128xf32>
    %53 = arith.addf %36, %52 : vector<64x128xf32>
    %c0_37 = arith.constant 0 : index
    %c0_38 = arith.constant 0 : index
    %c0_39 = arith.constant 0 : index
    %c0_40 = arith.constant 0 : index
    %54 = vector.load %arg8[%c0_37, %c0_38, %c0_39, %c0_40] : memref<1x9x9x128xf32, #tpu.memory_space<vmem>>, vector<1x8x8x128xf32>
    %55 = vector.shape_cast %54 : vector<1x8x8x128xf32> to vector<8x8x128xf32>
    %56 = vector.shape_cast %55 : vector<8x8x128xf32> to vector<64x128xf32>
    %57 = vector.broadcast %0 : vector<1x128xf32> to vector<64x128xf32>
    %58 = arith.mulf %56, %57 : vector<64x128xf32>
    %c3 = arith.constant 3 : index
    %c0_41 = arith.constant 0 : index
    %c0_42 = arith.constant 0 : index
    %59 = vector.load %arg5[%c3, %c0_41, %c0_42] : memref<9x64x1xf32, #tpu.memory_space<vmem>>, vector<1x64x1xf32>
    %60 = vector.shape_cast %59 : vector<1x64x1xf32> to vector<64x1xf32>
    %61 = vector.broadcast %1 : vector<1x128xf32> to vector<64x128xf32>
    %62 = vector.broadcast %60 : vector<64x1xf32> to vector<64x128xf32>
    %63 = arith.mulf %61, %62 : vector<64x128xf32>
    %64 = arith.addf %58, %63 : vector<64x128xf32>
    %cst_43 = arith.constant 0.000000e+00 : f32
    %65 = vector.broadcast %cst_43 : f32 to vector<64x128xf32>
    %66 = arith.maximumf %64, %65 : vector<64x128xf32>
    %c3_44 = arith.constant 3 : index
    %c0_45 = arith.constant 0 : index
    %c0_46 = arith.constant 0 : index
    %67 = vector.load %arg10[%c3_44, %c0_45, %c0_46] : memref<9x128x128xf32, #tpu.memory_space<vmem>>, vector<1x128x128xf32>
    %68 = vector.shape_cast %67 : vector<1x128x128xf32> to vector<128x128xf32>
    %cst_47 = arith.constant dense<0.000000e+00> : vector<64x128xf32>
    %69 = tpu.matmul %66, %68, %cst_47 {dimension_numbers = #tpu.dot_dimension_numbers<[1], [0], [0], [1], [0, 0, 1, 1], [], []>} : vector<64x128xf32>, vector<128x128xf32>, vector<64x128xf32> -> vector<64x128xf32>
    %70 = arith.addf %53, %69 : vector<64x128xf32>
    %c0_48 = arith.constant 0 : index
    %c0_49 = arith.constant 0 : index
    %c0_50 = arith.constant 0 : index
    %c0_51 = arith.constant 0 : index
    %71 = vector.load %arg9[%c0_48, %c0_49, %c0_50, %c0_51] : memref<1x9x9x128xf32, #tpu.memory_space<vmem>>, vector<1x8x8x128xf32>
    %72 = vector.shape_cast %71 : vector<1x8x8x128xf32> to vector<8x8x128xf32>
    %73 = vector.shape_cast %72 : vector<8x8x128xf32> to vector<64x128xf32>
    %74 = vector.broadcast %0 : vector<1x128xf32> to vector<64x128xf32>
    %75 = arith.mulf %73, %74 : vector<64x128xf32>
    %c4 = arith.constant 4 : index
    %c0_52 = arith.constant 0 : index
    %c0_53 = arith.constant 0 : index
    %76 = vector.load %arg5[%c4, %c0_52, %c0_53] : memref<9x64x1xf32, #tpu.memory_space<vmem>>, vector<1x64x1xf32>
    %77 = vector.shape_cast %76 : vector<1x64x1xf32> to vector<64x1xf32>
    %78 = vector.broadcast %1 : vector<1x128xf32> to vector<64x128xf32>
    %79 = vector.broadcast %77 : vector<64x1xf32> to vector<64x128xf32>
    %80 = arith.mulf %78, %79 : vector<64x128xf32>
    %81 = arith.addf %75, %80 : vector<64x128xf32>
    %cst_54 = arith.constant 0.000000e+00 : f32
    %82 = vector.broadcast %cst_54 : f32 to vector<64x128xf32>
    %83 = arith.maximumf %81, %82 : vector<64x128xf32>
    %c4_55 = arith.constant 4 : index
    %c0_56 = arith.constant 0 : index
    %c0_57 = arith.constant 0 : index
    %84 = vector.load %arg10[%c4_55, %c0_56, %c0_57] : memref<9x128x128xf32, #tpu.memory_space<vmem>>, vector<1x128x128xf32>
    %85 = vector.shape_cast %84 : vector<1x128x128xf32> to vector<128x128xf32>
    %cst_58 = arith.constant dense<0.000000e+00> : vector<64x128xf32>
    %86 = tpu.matmul %83, %85, %cst_58 {dimension_numbers = #tpu.dot_dimension_numbers<[1], [0], [0], [1], [0, 0, 1, 1], [], []>} : vector<64x128xf32>, vector<128x128xf32>, vector<64x128xf32> -> vector<64x128xf32>
    %87 = arith.addf %70, %86 : vector<64x128xf32>
    %c0_59 = arith.constant 0 : index
    %c0_60 = arith.constant 0 : index
    %c1_61 = arith.constant 1 : index
    %c0_62 = arith.constant 0 : index
    %88 = vector.load %arg8[%c0_59, %c0_60, %c1_61, %c0_62] : memref<1x9x9x128xf32, #tpu.memory_space<vmem>>, vector<1x8x8x128xf32>
    %89 = vector.shape_cast %88 : vector<1x8x8x128xf32> to vector<8x8x128xf32>
    %90 = vector.shape_cast %89 : vector<8x8x128xf32> to vector<64x128xf32>
    %91 = vector.broadcast %0 : vector<1x128xf32> to vector<64x128xf32>
    %92 = arith.mulf %90, %91 : vector<64x128xf32>
    %c5 = arith.constant 5 : index
    %c0_63 = arith.constant 0 : index
    %c0_64 = arith.constant 0 : index
    %93 = vector.load %arg5[%c5, %c0_63, %c0_64] : memref<9x64x1xf32, #tpu.memory_space<vmem>>, vector<1x64x1xf32>
    %94 = vector.shape_cast %93 : vector<1x64x1xf32> to vector<64x1xf32>
    %95 = vector.broadcast %1 : vector<1x128xf32> to vector<64x128xf32>
    %96 = vector.broadcast %94 : vector<64x1xf32> to vector<64x128xf32>
    %97 = arith.mulf %95, %96 : vector<64x128xf32>
    %98 = arith.addf %92, %97 : vector<64x128xf32>
    %cst_65 = arith.constant 0.000000e+00 : f32
    %99 = vector.broadcast %cst_65 : f32 to vector<64x128xf32>
    %100 = arith.maximumf %98, %99 : vector<64x128xf32>
    %c5_66 = arith.constant 5 : index
    %c0_67 = arith.constant 0 : index
    %c0_68 = arith.constant 0 : index
    %101 = vector.load %arg10[%c5_66, %c0_67, %c0_68] : memref<9x128x128xf32, #tpu.memory_space<vmem>>, vector<1x128x128xf32>
    %102 = vector.shape_cast %101 : vector<1x128x128xf32> to vector<128x128xf32>
    %cst_69 = arith.constant dense<0.000000e+00> : vector<64x128xf32>
    %103 = tpu.matmul %100, %102, %cst_69 {dimension_numbers = #tpu.dot_dimension_numbers<[1], [0], [0], [1], [0, 0, 1, 1], [], []>} : vector<64x128xf32>, vector<128x128xf32>, vector<64x128xf32> -> vector<64x128xf32>
    %104 = arith.addf %87, %103 : vector<64x128xf32>
    %c0_70 = arith.constant 0 : index
    %c1_71 = arith.constant 1 : index
    %c0_72 = arith.constant 0 : index
    %c0_73 = arith.constant 0 : index
    %105 = vector.load %arg6[%c0_70, %c1_71, %c0_72, %c0_73] : memref<1x9x9x128xf32, #tpu.memory_space<vmem>>, vector<1x8x8x128xf32>
    %106 = vector.shape_cast %105 : vector<1x8x8x128xf32> to vector<8x8x128xf32>
    %107 = vector.shape_cast %106 : vector<8x8x128xf32> to vector<64x128xf32>
    %108 = vector.broadcast %0 : vector<1x128xf32> to vector<64x128xf32>
    %109 = arith.mulf %107, %108 : vector<64x128xf32>
    %c6 = arith.constant 6 : index
    %c0_74 = arith.constant 0 : index
    %c0_75 = arith.constant 0 : index
    %110 = vector.load %arg5[%c6, %c0_74, %c0_75] : memref<9x64x1xf32, #tpu.memory_space<vmem>>, vector<1x64x1xf32>
    %111 = vector.shape_cast %110 : vector<1x64x1xf32> to vector<64x1xf32>
    %112 = vector.broadcast %1 : vector<1x128xf32> to vector<64x128xf32>
    %113 = vector.broadcast %111 : vector<64x1xf32> to vector<64x128xf32>
    %114 = arith.mulf %112, %113 : vector<64x128xf32>
    %115 = arith.addf %109, %114 : vector<64x128xf32>
    %cst_76 = arith.constant 0.000000e+00 : f32
    %116 = vector.broadcast %cst_76 : f32 to vector<64x128xf32>
    %117 = arith.maximumf %115, %116 : vector<64x128xf32>
    %c6_77 = arith.constant 6 : index
    %c0_78 = arith.constant 0 : index
    %c0_79 = arith.constant 0 : index
    %118 = vector.load %arg10[%c6_77, %c0_78, %c0_79] : memref<9x128x128xf32, #tpu.memory_space<vmem>>, vector<1x128x128xf32>
    %119 = vector.shape_cast %118 : vector<1x128x128xf32> to vector<128x128xf32>
    %cst_80 = arith.constant dense<0.000000e+00> : vector<64x128xf32>
    %120 = tpu.matmul %117, %119, %cst_80 {dimension_numbers = #tpu.dot_dimension_numbers<[1], [0], [0], [1], [0, 0, 1, 1], [], []>} : vector<64x128xf32>, vector<128x128xf32>, vector<64x128xf32> -> vector<64x128xf32>
    %121 = arith.addf %104, %120 : vector<64x128xf32>
    %c0_81 = arith.constant 0 : index
    %c1_82 = arith.constant 1 : index
    %c0_83 = arith.constant 0 : index
    %c0_84 = arith.constant 0 : index
    %122 = vector.load %arg7[%c0_81, %c1_82, %c0_83, %c0_84] : memref<1x9x9x128xf32, #tpu.memory_space<vmem>>, vector<1x8x8x128xf32>
    %123 = vector.shape_cast %122 : vector<1x8x8x128xf32> to vector<8x8x128xf32>
    %124 = vector.shape_cast %123 : vector<8x8x128xf32> to vector<64x128xf32>
    %125 = vector.broadcast %0 : vector<1x128xf32> to vector<64x128xf32>
    %126 = arith.mulf %124, %125 : vector<64x128xf32>
    %c7 = arith.constant 7 : index
    %c0_85 = arith.constant 0 : index
    %c0_86 = arith.constant 0 : index
    %127 = vector.load %arg5[%c7, %c0_85, %c0_86] : memref<9x64x1xf32, #tpu.memory_space<vmem>>, vector<1x64x1xf32>
    %128 = vector.shape_cast %127 : vector<1x64x1xf32> to vector<64x1xf32>
    %129 = vector.broadcast %1 : vector<1x128xf32> to vector<64x128xf32>
    %130 = vector.broadcast %128 : vector<64x1xf32> to vector<64x128xf32>
    %131 = arith.mulf %129, %130 : vector<64x128xf32>
    %132 = arith.addf %126, %131 : vector<64x128xf32>
    %cst_87 = arith.constant 0.000000e+00 : f32
    %133 = vector.broadcast %cst_87 : f32 to vector<64x128xf32>
    %134 = arith.maximumf %132, %133 : vector<64x128xf32>
    %c7_88 = arith.constant 7 : index
    %c0_89 = arith.constant 0 : index
    %c0_90 = arith.constant 0 : index
    %135 = vector.load %arg10[%c7_88, %c0_89, %c0_90] : memref<9x128x128xf32, #tpu.memory_space<vmem>>, vector<1x128x128xf32>
    %136 = vector.shape_cast %135 : vector<1x128x128xf32> to vector<128x128xf32>
    %cst_91 = arith.constant dense<0.000000e+00> : vector<64x128xf32>
    %137 = tpu.matmul %134, %136, %cst_91 {dimension_numbers = #tpu.dot_dimension_numbers<[1], [0], [0], [1], [0, 0, 1, 1], [], []>} : vector<64x128xf32>, vector<128x128xf32>, vector<64x128xf32> -> vector<64x128xf32>
    %138 = arith.addf %121, %137 : vector<64x128xf32>
    %c0_92 = arith.constant 0 : index
    %c1_93 = arith.constant 1 : index
    %c1_94 = arith.constant 1 : index
    %c0_95 = arith.constant 0 : index
    %139 = vector.load %arg6[%c0_92, %c1_93, %c1_94, %c0_95] : memref<1x9x9x128xf32, #tpu.memory_space<vmem>>, vector<1x8x8x128xf32>
    %140 = vector.shape_cast %139 : vector<1x8x8x128xf32> to vector<8x8x128xf32>
    %141 = vector.shape_cast %140 : vector<8x8x128xf32> to vector<64x128xf32>
    %142 = vector.broadcast %0 : vector<1x128xf32> to vector<64x128xf32>
    %143 = arith.mulf %141, %142 : vector<64x128xf32>
    %c8 = arith.constant 8 : index
    %c0_96 = arith.constant 0 : index
    %c0_97 = arith.constant 0 : index
    %144 = vector.load %arg5[%c8, %c0_96, %c0_97] : memref<9x64x1xf32, #tpu.memory_space<vmem>>, vector<1x64x1xf32>
    %145 = vector.shape_cast %144 : vector<1x64x1xf32> to vector<64x1xf32>
    %146 = vector.broadcast %1 : vector<1x128xf32> to vector<64x128xf32>
    %147 = vector.broadcast %145 : vector<64x1xf32> to vector<64x128xf32>
    %148 = arith.mulf %146, %147 : vector<64x128xf32>
    %149 = arith.addf %143, %148 : vector<64x128xf32>
    %cst_98 = arith.constant 0.000000e+00 : f32
    %150 = vector.broadcast %cst_98 : f32 to vector<64x128xf32>
    %151 = arith.maximumf %149, %150 : vector<64x128xf32>
    %c8_99 = arith.constant 8 : index
    %c0_100 = arith.constant 0 : index
    %c0_101 = arith.constant 0 : index
    %152 = vector.load %arg10[%c8_99, %c0_100, %c0_101] : memref<9x128x128xf32, #tpu.memory_space<vmem>>, vector<1x128x128xf32>
    %153 = vector.shape_cast %152 : vector<1x128x128xf32> to vector<128x128xf32>
    %cst_102 = arith.constant dense<0.000000e+00> : vector<64x128xf32>
    %154 = tpu.matmul %151, %153, %cst_102 {dimension_numbers = #tpu.dot_dimension_numbers<[1], [0], [0], [1], [0, 0, 1, 1], [], []>} : vector<64x128xf32>, vector<128x128xf32>, vector<64x128xf32> -> vector<64x128xf32>
    %155 = arith.addf %138, %154 : vector<64x128xf32>
    %c0_103 = arith.constant 0 : index
    %c0_104 = arith.constant 0 : index
    %156 = vector.load %arg3[%c0_103, %c0_104] : memref<1x128xf32, #tpu.memory_space<vmem>>, vector<1x128xf32>
    %157 = vector.broadcast %156 : vector<1x128xf32> to vector<64x128xf32>
    %158 = arith.mulf %155, %157 : vector<64x128xf32>
    %c0_105 = arith.constant 0 : index
    %c0_106 = arith.constant 0 : index
    %159 = vector.load %arg4[%c0_105, %c0_106] : memref<1x128xf32, #tpu.memory_space<vmem>>, vector<1x128xf32>
    %160 = vector.broadcast %159 : vector<1x128xf32> to vector<64x128xf32>
    %161 = arith.addf %158, %160 : vector<64x128xf32>
    %cst_107 = arith.constant 0.000000e+00 : f32
    %162 = vector.broadcast %cst_107 : f32 to vector<64x128xf32>
    %163 = arith.maximumf %161, %162 : vector<64x128xf32>
    %c0_108 = arith.constant 0 : index
    %c0_109 = arith.constant 0 : index
    %c0_110 = arith.constant 0 : index
    %164 = vector.load %arg11[%c0_108, %c0_109, %c0_110] : memref<1x64x128xf32, #tpu.memory_space<vmem>>, vector<1x64x128xf32>
    %165 = vector.shape_cast %164 : vector<1x64x128xf32> to vector<64x128xf32>
    %166 = vector.shape_cast %163 : vector<64x128xf32> to vector<1x64x128xf32>
    tpu.vector_store %arg11[%c0_108, %c0_109, %c0_110], %166 {strides = array<i32>} : memref<1x64x128xf32, #tpu.memory_space<vmem>>, vector<1x64x128xf32>,
    return
  }
  func.func @transform_0(%arg0: i32) -> (i32, i32) {
    %c0_i32 = arith.constant 0 : i32
    %c0_i32_0 = arith.constant 0 : i32
    %c0_i32_1 = arith.constant 0 : i32
    return %c0_i32, %c0_i32_0 : i32, i32
  }
  func.func @transform_1(%arg0: i32) -> (i32, i32) {
    %c0_i32 = arith.constant 0 : i32
    %c0_i32_0 = arith.constant 0 : i32
    %c0_i32_1 = arith.constant 0 : i32
    return %c0_i32, %c0_i32_0 : i32, i32
  }
  func.func @transform_2(%arg0: i32) -> (i32, i32) {
    %c0_i32 = arith.constant 0 : i32
    %c0_i32_0 = arith.constant 0 : i32
    %c0_i32_1 = arith.constant 0 : i32
    return %c0_i32, %c0_i32_0 : i32, i32
  }
  func.func @transform_3(%arg0: i32) -> (i32, i32) {
    %c0_i32 = arith.constant 0 : i32
    %c0_i32_0 = arith.constant 0 : i32
    %c0_i32_1 = arith.constant 0 : i32
    return %c0_i32, %c0_i32_0 : i32, i32
  }
  func.func @transform_4(%arg0: i32) -> (i32, i32, i32) {
    %c0_i32 = arith.constant 0 : i32
    %c0_i32_0 = arith.constant 0 : i32
    %c0_i32_1 = arith.constant 0 : i32
    %c0_i32_2 = arith.constant 0 : i32
    return %c0_i32, %c0_i32_0, %c0_i32_1 : i32, i32, i32
  }
  func.func @transform_5(%arg0: i32) -> (i32, i32, i32, i32) {
    %c0_i32 = arith.constant 0 : i32
    %c0_i32_0 = arith.constant 0 : i32
    %c0_i32_1 = arith.constant 0 : i32
    %c0_i32_2 = arith.constant 0 : i32
    return %arg0, %c0_i32, %c0_i32_0, %c0_i32_1 : i32, i32, i32, i32
  }
  func.func @transform_6(%arg0: i32) -> (i32, i32, i32, i32) {
    %c0_i32 = arith.constant 0 : i32
    %c0_i32_0 = arith.constant 0 : i32
    %c0_i32_1 = arith.constant 0 : i32
    %c0_i32_2 = arith.constant 0 : i32
    return %arg0, %c0_i32, %c0_i32_0, %c0_i32_1 : i32, i32, i32, i32
  }
  func.func @transform_7(%arg0: i32) -> (i32, i32, i32, i32) {
    %c0_i32 = arith.constant 0 : i32
    %c0_i32_0 = arith.constant 0 : i32
    %c0_i32_1 = arith.constant 0 : i32
    %c0_i32_2 = arith.constant 0 : i32
    return %arg0, %c0_i32, %c0_i32_0, %c0_i32_1 : i32, i32, i32, i32
  }
  func.func @transform_8(%arg0: i32) -> (i32, i32, i32, i32) {
    %c0_i32 = arith.constant 0 : i32
    %c0_i32_0 = arith.constant 0 : i32
    %c0_i32_1 = arith.constant 0 : i32
    %c0_i32_2 = arith.constant 0 : i32
    return %arg0, %c0_i32, %c0_i32_0, %c0_i32_1 : i32, i32, i32, i32
  }
  func.func @transform_9(%arg0: i32) -> (i32, i32, i32) {
    %c0_i32 = arith.constant 0 : i32
    %c0_i32_0 = arith.constant 0 : i32
    %c0_i32_1 = arith.constant 0 : i32
    %c0_i32_2 = arith.constant 0 : i32
    return %c0_i32, %c0_i32_0, %c0_i32_1 : i32, i32, i32
  }
  func.func @transform_10(%arg0: i32) -> (i32, i32, i32) {
    %c0_i32 = arith.constant 0 : i32
    %c0_i32_0 = arith.constant 0 : i32
    %c0_i32_1 = arith.constant 0 : i32
    return %arg0, %c0_i32, %c0_i32_0 : i32, i32, i32
  }
}

</mosaic_0001>

<bundles_post_ra>
// kernel: tpu_custom_call.1
= control target key start
LH: loop header
LB: loop body
LE: loop exit
PB: predicated region body
PF: predicated region fallthrough
CT: control target
= control target key end

     0   :  { %15 = vsyncpa [#allocation3], 0  ;;  %s4724_s0 = inlined_call_operand.vmem [shape: f32[1,128], index: 0, kind: input, shape index: {}]   ;;  %s4725_s1 = inlined_call_operand.vmem [shape: f32[1,128], index: 1, kind: input, shape index: {}]   ;;  %s4726_s2 = inlined_call_operand.vmem [shape: f32[1,128], index: 2, kind: input, shape index: {}]   ;;  %s4727_s3 = inlined_call_operand.vmem [shape: f32[1,128], index: 3, kind: input, shape index: {}]   ;;  %s4728_s4 = inlined_call_operand.vmem [shape: f32[9,64,1], index: 4, kind: input, shape index: {}]   ;;  %s4729_s5 = inlined_call_operand.vmem [shape: f32[2,9,9,128], index: 5, kind: input, shape index: {}]   ;;  %s4730_s6 = inlined_call_operand.vmem [shape: f32[2,9,9,128], index: 6, kind: input, shape index: {}]   ;;  %s4731_s7 = inlined_call_operand.vmem [shape: f32[2,9,9,128], index: 7, kind: input, shape index: {}]   ;;  %s4732_s8 = inlined_call_operand.vmem [shape: f32[2,9,9,128], index: 8, kind: input, shape index: {}]   ;;  %s4733_s9 = inlined_call_operand.vmem [shape: f32[9,128,128], index: 9, kind: input, shape index: {}]   ;;  %s4734_s10 = inlined_call_operand.hbm [shape: f32[2,64,128], index: 10, kind: output, shape index: {}]  }
   0x1   :  { %17 = vsyncpa [#allocation3 + $0x1], 0  ;;  %s3592_s13 = smov 0   ;;  %s3594_s14 = smov 0  }
   0x2   :  { %s3596_s15 = smov 0   ;;  %s3598_s16 = smov 0  }
   0x3 LB: > { %s3613_s17 = sadd.s32 4294967295, %s3531_s16   ;;  %s2545_s18 = sadd.s32 4294967294, %s3531_s16   ;;  %s3531_s16 = sphi %s3598_s16, %s4748_s16   ;;  %s3527_s15 = sphi %s3596_s15, %s4747_s15   ;;  %s3523_s14 = sphi %s3594_s14, %s4746_s14   ;;  %s3519_s13 = sphi %s3592_s13, %s4745_s13  }
   0x4   : > { %s3617_s19 = sadd.s32 1, %s3531_s16   ;;  %s260_s20 = sadd.s32 1, %s3527_s15 }
   0x5   : > { %s257_s21 = ssub.s32 %s3531_s16, %s3617_s19  ;;  %p270_p0 = scmp.ne.s32.totalorder %s3527_s15, %s3523_s14 }
   0x6   : > { %p258_p1 = scmp.eq.s32.totalorder %s257_s21, 0  ;;  %p271_p2 = scmp.eq.s32.totalorder %s3613_s17, 1 }
   0x7   : > { %p276_p3 = scmp.ne.s32.totalorder %s3523_s14, %s3519_s13  ;;  %p277_p4 = scmp.eq.s32.totalorder %s2545_s18, 1 }
   0x8   : > { %s3628_s22 = scalar_select %p258_p1, %s3527_s15, %s260_s20  }
   0x9   : > { %p3630_p5 = por %p271_p2, %p270_p0  ;;  %p3634_p6 = por %p277_p4, %p276_p3 }
   0xa   : > { %p2548_p7 = scmp.ge.s32.totalorder %s3531_s16, 1  ;;  %p345_p8 = scmp.lt.s32.totalorder %s3531_s16, 3 }
   0xc   : > { %p346_p9 = pnand %p2548_p7, %p345_p8 }
   0xe   : > { %349 = sbr.rel (%p346_p9) target bundleno = 537 (0x219), region = 60 }
  0x13   : > { %v443_v0 = vld [vmem:[%s4728_s4 + $0x8] sm:$0xff]  ;;  %v442_v1 = vld [vmem:[%s4728_s4] sm:$0xff]  ;;  %v3533_v2 = vmov 0   ;;  %v2558_v5 = vld [vmem:[%s4728_s4 + $0x50] sm:$0xff]  ;;  %p398_p10 = scmp.lt.s32.totalorder %s3613_s17, 1  ;;  %s395_s25 = sand.u32 1, %s3523_s14  }
  0x14   : > { %3468 = vset.pattern.permute.xlu1 %v3533_v2  ;;  %3467 = vset.pattern.permute.xlu0 %v3533_v2  ;;  %v2557_v3 = vld [vmem:[%s4728_s4 + $0x48] sm:$0xff]  ;;  %v2556_v4 = vld [vmem:[%s4728_s4 + $0x40] sm:$0xff]  ;;  %v444_v6 = vld [vmem:[%s4728_s4 + $0x10] sm:$0xff]  ;;  %s3534_s27 = smov [#allocation2]  }
  0x15   : > { %463 = vperm.xlu1 %3468, %v443_v0   ;;  %458 = vperm.xlu0 %3467, %v442_v1   ;;  %v2559_v7 = vld [vmem:[%s4728_s4 + $0x58] sm:$0xff]  ;;  %v2560_v9 = vld [vmem:[%s4728_s4 + $0x60] sm:$0xff]  ;;  %v534_v12 = vld [vmem:[%s4733_s9 + $0x70] sm:$0xff]  ;;  %s399_s29 = scalar_select %p398_p10, %s3613_s17, 1 }
  0x16   : > { %v445_v8 = vld [vmem:[%s4728_s4 + $0x18] sm:$0xff]  ;;  %v446_v10 = vld [vmem:[%s4728_s4 + $0x20] sm:$0xff]  ;;  %v2578_v14 = vld [vmem:[%s4733_s9 + $0xf0] sm:$0xff] }
  0x17   : > { %v535_v11 = vld [vmem:[%s4733_s9 + $0x78] sm:$0xff]  ;;  %v2561_v15 = vld [vmem:[%s4728_s4 + $0x68] sm:$0xff]  ;;  %v532_v19 = vld [vmem:[%s4733_s9 + $0x60] sm:$0xff]  ;;  %s3924_s20 = smul.u32 144, %s399_s29 }
  0x18   : > { %3040 = vmatprep.subr.mxu1 %v535_v11  ;;  %v2579_v13 = vld [vmem:[%s4733_s9 + $0xf8] sm:$0xff]  ;;  %v447_v16 = vld [vmem:[%s4728_s4 + $0x28] sm:$0xff]  ;;  %v2562_v20 = vld [vmem:[%s4728_s4 + $0x70] sm:$0xff] }
  0x19   : > { %568 = vperm.xlu1 %3468, %v2557_v3   ;;  %563 = vperm.xlu0 %3467, %v2556_v4   ;;  %v533_v17 = vld [vmem:[%s4733_s9 + $0x68] sm:$0xff]  ;;  %v448_v21 = vld [vmem:[%s4728_s4 + $0x30] sm:$0xff]  ;;  %v2576_v22 = vld [vmem:[%s4733_s9 + $0xe0] sm:$0xff]  ;;  %s3936_s11 = scalar_lea.vmem %s4729_s5, %s3924_s20  ;;  %s3955_s30 = scalar_lea.vmem %s4730_s6, %s3924_s20 }
  0x1a   : > { %3041 = vmatpush3.msra.mxu1 %v535_v11  ;;  %2996 = vmatprep.subr.mxu0 %v2579_v13  ;;  %v2577_v18 = vld [vmem:[%s4733_s9 + $0xe8] sm:$0xff]  ;;  %v531_v23 = vld [vmem:[%s4733_s9 + $0x58] sm:$0xff]  ;;  %v530_v27 = vld [vmem:[%s4733_s9 + $0x50] sm:$0xff]  ;;  %s4092_s12 = scalar_lea.vmem %s4731_s7, %s3924_s20  ;;  %s4248_s18 = scalar_lea.vmem %s4732_s8, %s3924_s20 }
  0x1b   : > { %3042 = vmatprep.subr.mxu1 %v534_v12  ;;  %2997 = vmatpush3.msra.mxu0 %v2579_v13  ;;  %v2575_v24 = vld [vmem:[%s4733_s9 + $0xd8] sm:$0xff]  ;;  %v2574_v28 = vld [vmem:[%s4733_s9 + $0xd0] sm:$0xff]  ;;  %v529_v29 = vld [vmem:[%s4733_s9 + $0x48] sm:$0xff]  ;;  %s2549_s20 = sshll.u32 %s395_s25, 6 }
  0x1c   : > { %3043 = vmatpush3.msra.mxu1 %v534_v12  ;;  %2998 = vmatprep.subr.mxu0 %v2578_v14  ;;  %v2563_v25 = vld [vmem:[%s4728_s4 + $0x78] sm:$0xff]  ;;  %v2604_v30 = vld [vmem:[%s4728_s4 + $0xc0] sm:$0xff]  ;;  %v2573_v32 = vld [vmem:[%s4733_s9 + $0xc8] sm:$0xff]  ;;  %s397_s28 = scalar_lea.vmem [#allocation2], %s2549_s20 }
  0x1d   : > { %573 = vperm.xlu1 %3468, %v2558_v5   ;;  %468 = vperm.xlu0 %3467, %v444_v6   ;;  %v449_v26 = vld [vmem:[%s4728_s4 + $0x38] sm:$0xff]  ;;  %v2580_v31 = vld [vmem:[%s4728_s4 + $0x80] sm:$0xff]  ;;  %v2605_v35 = vld [vmem:[%s4728_s4 + $0xc8] sm:$0xff] }
  0x1e   : > { %3044 = vmatprep.subr.mxu1 %v533_v17  ;;  %2999 = vmatpush3.msra.mxu0 %v2578_v14  ;;  %v528_v33 = vld [vmem:[%s4733_s9 + $0x40] sm:$0xff]  ;;  %v2581_v36 = vld [vmem:[%s4728_s4 + $0x88] sm:$0xff]  ;;  %v527_v37 = vld [vmem:[%s4733_s9 + $0x38] sm:$0xff] }
  0x1f   : > { %3045 = vmatpush3.msra.mxu1 %v533_v17  ;;  %3000 = vmatprep.subr.mxu0 %v2577_v18  ;;  %v2572_v34 = vld [vmem:[%s4733_s9 + $0xc0] sm:$0xff]  ;;  %v2571_v38 = vld [vmem:[%s4733_s9 + $0xb8] sm:$0xff]  ;;  %v526_v39 = vld [vmem:[%s4733_s9 + $0x30] sm:$0xff] }
  0x20   : > { %3046 = vmatprep.subr.mxu1 %v532_v19  ;;  %3001 = vmatpush3.msra.mxu0 %v2577_v18  ;;  %v2606_v40 = vld [vmem:[%s4728_s4 + $0xd0] sm:$0xff]  ;;  %v525_v43 = vld [vmem:[%s4733_s9 + $0x28] sm:$0xff]  ;;  %v2607_v45 = vld [vmem:[%s4728_s4 + $0xd8] sm:$0xff] }
  0x21   : > { %578 = vperm.xlu1 %3468, %v2559_v7   ;;  %473 = vperm.xlu0 %3467, %v445_v8   ;;  %v2582_v41 = vld [vmem:[%s4728_s4 + $0x90] sm:$0xff]  ;;  %v2569_v44 = vld [vmem:[%s4733_s9 + $0xa8] sm:$0xff]  ;;  %v2583_v46 = vld [vmem:[%s4728_s4 + $0x98] sm:$0xff] }
  0x22   : > { %3047 = vmatpush3.msra.mxu1 %v532_v19  ;;  %3002 = vmatprep.subr.mxu0 %v2576_v22  ;;  %v2570_v42 = vld [vmem:[%s4733_s9 + $0xb0] sm:$0xff]  ;;  %v524_v47 = vld [vmem:[%s4733_s9 + $0x20] sm:$0xff]  ;;  %v523_v49 = vld [vmem:[%s4733_s9 + $0x18] sm:$0xff] }
  0x23   : > { %3048 = vmatprep.subr.mxu1 %v531_v23  ;;  %3003 = vmatpush3.msra.mxu0 %v2576_v22  ;;  %v2568_v48 = vld [vmem:[%s4733_s9 + $0xa0] sm:$0xff]  ;;  %v2567_v52 = vld [vmem:[%s4733_s9 + $0x98] sm:$0xff]  ;;  %v522_v53 = vld [vmem:[%s4733_s9 + $0x10] sm:$0xff] }
  0x24   : > { %3049 = vmatpush3.msra.mxu1 %v531_v23  ;;  %3004 = vmatprep.subr.mxu0 %v2575_v24  ;;  %v2608_v50 = vld [vmem:[%s4728_s4 + $0xe0] sm:$0xff]  ;;  %v2566_v54 = vld [vmem:[%s4733_s9 + $0x90] sm:$0xff]  ;;  %v2609_v55 = vld [vmem:[%s4728_s4 + $0xe8] sm:$0xff] }
  0x25   : > { %583 = vperm.xlu1 %3468, %v2560_v9   ;;  %478 = vperm.xlu0 %3467, %v446_v10   ;;  %v2584_v51 = vld [vmem:[%s4728_s4 + $0xa0] sm:$0xff]  ;;  %v2585_v56 = vld [vmem:[%s4728_s4 + $0xa8] sm:$0xff]  ;;  %v2610_v60 = vld [vmem:[%s4728_s4 + $0xf0] sm:$0xff] }
  0x26   : > { %3050 = vmatprep.subr.mxu1 %v530_v27  ;;  %3005 = vmatpush3.msra.mxu0 %v2575_v24  ;;  %v521_v57 = vld [vmem:[%s4733_s9 + $0x8] sm:$0xff]  ;;  %v520_v59 = vld [vmem:[%s4733_s9] sm:$0xff]  ;;  %v2586_v61 = vld [vmem:[%s4728_s4 + $0xb0] sm:$0xff] }
  0x27   : > { %3051 = vmatpush3.msra.mxu1 %v530_v27  ;;  %3006 = vmatprep.subr.mxu0 %v2574_v28  ;;  %v2565_v58 = vld [vmem:[%s4733_s9 + $0x88] sm:$0xff]  ;;  %v2564_v62 = vld [vmem:[%s4733_s9 + $0x80] sm:$0xff]  ;;  %v3829_v63 = vld [vmem:[%s4733_s9 + $0x1f8] sm:$0xff] }
  0x28   : > { %3052 = vmatprep.subr.mxu1 %v529_v29  ;;  %3007 = vmatpush3.msra.mxu0 %v2574_v28  ;;  %v3834_v0 = vld [vmem:[%s4733_s9 + $0x178] sm:$0xff]  ;;  %v2652_v3 = vld [vmem:[%s4728_s4 + $0x140] sm:$0xff]  ;;  %v2653_v5 = vld [vmem:[%s4728_s4 + $0x148] sm:$0xff] }
  0x29   : > { %588 = vperm.xlu1 %3468, %v2561_v15   ;;  %483 = vperm.xlu0 %3467, %v447_v16   ;;  %v2611_v1 = vld [vmem:[%s4728_s4 + $0xf8] sm:$0xff]  ;;  %v2628_v4 = vld [vmem:[%s4728_s4 + $0x100] sm:$0xff]  ;;  %v2629_v6 = vld [vmem:[%s4728_s4 + $0x108] sm:$0xff] }
  0x2a   : > { %3053 = vmatpush3.msra.mxu1 %v529_v29  ;;  %3008 = vmatprep.subr.mxu0 %v2573_v32  ;;  %v2587_v2 = vld [vmem:[%s4728_s4 + $0xb8] sm:$0xff]  ;;  %v2654_v7 = vld [vmem:[%s4728_s4 + $0x150] sm:$0xff]  ;;  %v2656_v11 = vld [vmem:[%s4728_s4 + $0x160] sm:$0xff] }
  0x2b   : > { %3054 = vmatprep.subr.mxu1 %v528_v33  ;;  %3009 = vmatpush3.msra.mxu0 %v2573_v32  ;;  %v2630_v8 = vld [vmem:[%s4728_s4 + $0x110] sm:$0xff]  ;;  %v2655_v9 = vld [vmem:[%s4728_s4 + $0x158] sm:$0xff]  ;;  %v2632_v12 = vld [vmem:[%s4728_s4 + $0x120] sm:$0xff] }
  0x2c   : > { %3055 = vmatpush3.msra.mxu1 %v528_v33  ;;  %3010 = vmatprep.subr.mxu0 %v2572_v34  ;;  %v2631_v10 = vld [vmem:[%s4728_s4 + $0x118] sm:$0xff]  ;;  %v2657_v13 = vld [vmem:[%s4728_s4 + $0x168] sm:$0xff]  ;;  %v2658_v15 = vld [vmem:[%s4728_s4 + $0x170] sm:$0xff] }
  0x2d   : > { %593 = vperm.xlu1 %3468, %v2562_v20   ;;  %488 = vperm.xlu0 %3467, %v448_v21   ;;  %v2633_v14 = vld [vmem:[%s4728_s4 + $0x128] sm:$0xff]  ;;  %v2634_v16 = vld [vmem:[%s4728_s4 + $0x130] sm:$0xff]  ;;  %v2659_v17 = vld [vmem:[%s4728_s4 + $0x178] sm:$0xff] }
  0x2e   : > { %3056 = vmatprep.subr.mxu1 %v527_v37  ;;  %3011 = vmatpush3.msra.mxu0 %v2572_v34  ;;  %v2635_v18 = vld [vmem:[%s4728_s4 + $0x138] sm:$0xff]  ;;  %v2716_v19 = vld [vmem:[%s4728_s4 + $0x1c0] sm:$0xff]  ;;  %v2717_v21 = vld [vmem:[%s4728_s4 + $0x1c8] sm:$0xff] }
  0x2f   : > { %3057 = vmatpush3.msra.mxu1 %v527_v37  ;;  %3012 = vmatprep.subr.mxu0 %v2571_v38  ;;  %v2684_v20 = vld [vmem:[%s4728_s4 + $0x180] sm:$0xff]  ;;  %v2685_v22 = vld [vmem:[%s4728_s4 + $0x188] sm:$0xff]  ;;  %v2718_v23 = vld [vmem:[%s4728_s4 + $0x1d0] sm:$0xff] }
  0x30   : > { %3058 = vmatprep.subr.mxu1 %v526_v39  ;;  %3013 = vmatpush3.msra.mxu0 %v2571_v38  ;;  %v2686_v24 = vld [vmem:[%s4728_s4 + $0x190] sm:$0xff]  ;;  %v2720_v27 = vld [vmem:[%s4728_s4 + $0x1e0] sm:$0xff]  ;;  %v2721_v29 = vld [vmem:[%s4728_s4 + $0x1e8] sm:$0xff] }
  0x31   : > { %598 = vperm.xlu1 %3468, %v2563_v25   ;;  %493 = vperm.xlu0 %3467, %v449_v26   ;;  %v2719_v25 = vld [vmem:[%s4728_s4 + $0x1d8] sm:$0xff]  ;;  %v2688_v28 = vld [vmem:[%s4728_s4 + $0x1a0] sm:$0xff]  ;;  %v2690_v32 = vld [vmem:[%s4728_s4 + $0x1b0] sm:$0xff] }
  0x32   : > { %3059 = vmatpush3.msra.mxu1 %v526_v39  ;;  %3014 = vmatprep.subr.mxu0 %v2570_v42  ;;  %v2687_v26 = vld [vmem:[%s4728_s4 + $0x198] sm:$0xff]  ;;  %v3947_v33 = vld [vmem:[%s4724_s0] ss:$0 sm:$0xff]  ;;  %v421_v34 = vld [vmem:[%s3936_s11 + $0x10] sm:$0xff] }
  0x33   : > { %3060 = vmatprep.subr.mxu1 %v525_v43  ;;  %3015 = vmatpush3.msra.mxu0 %v2570_v42  ;;  %v2723_v37 = vld [vmem:[%s4728_s4 + $0x1f8] sm:$0xff]  ;;  %v435_v39 = vmul.f32 %v3947_v33, %v421_v34 }
  0x34   : > { %3061 = vmatpush3.msra.mxu1 %v525_v43  ;;  %3016 = vmatprep.subr.mxu0 %v2569_v44  ;;  %v2691_v38 = vld [vmem:[%s4728_s4 + $0x1b8] sm:$0xff]  ;;  %v537_v43 = vld [vmem:[%s3955_s30 + $0x10] sm:$0xff] }
  0x35   : > { %1098 = vperm.xlu1 %3468, %v2604_v30   ;;  %879 = vperm.xlu0 %3467, %v2580_v31   ;;  %v2689_v30 = vld [vmem:[%s4728_s4 + $0x1a8] sm:$0xff]  ;;  %v2722_v31 = vld [vmem:[%s4728_s4 + $0x1f0] sm:$0xff]  ;;  %v2755_v34 = vld [vmem:[%s4728_s4 + $0x238] sm:$0xff] }
  0x36   : > { %3062 = vmatprep.subr.mxu1 %v524_v47  ;;  %3017 = vmatpush3.msra.mxu0 %v2569_v44  ;;  %v536_v44 = vld [vmem:[%s3955_s30] sm:$0xff] }
  0x37   : > { %3063 = vmatpush3.msra.mxu1 %v524_v47  ;;  %3018 = vmatprep.subr.mxu0 %v2568_v48  ;;  %v2752_v47 = vld [vmem:[%s4728_s4 + $0x220] sm:$0xff] }
  0x38   : > { %3064 = vmatprep.subr.mxu1 %v523_v49  ;;  %3019 = vmatpush3.msra.mxu0 %v2568_v48  ;;  %v2748_v48 = vld [vmem:[%s4728_s4 + $0x200] sm:$0xff] }
  0x39   : > { %1103 = vperm.xlu1 %3468, %v2605_v35   ;;  %884 = vperm.xlu0 %3467, %v2581_v36   ;;  %v420_v35 = vld [vmem:[%s3936_s11] sm:$0xff] }
  0x3a   : > { %3065 = vmatpush3.msra.mxu1 %v523_v49  ;;  %3020 = vmatprep.subr.mxu0 %v2567_v52  ;;  %v3960_v36 = vld [vmem:[%s4725_s1] ss:$0 sm:$0xff] }
  0x3b   : > { %3066 = vmatprep.subr.mxu1 %v522_v53  ;;  %3021 = vmatpush3.msra.mxu0 %v2567_v52  ;;  %v544_v52 = vmul.f32 %v3947_v33, %v536_v44  ;;  %v2624_v44 = vld [vmem:[%s4733_s9 + $0x1e0] sm:$0xff] }
  0x3c   : > { %3067 = vmatpush3.msra.mxu1 %v522_v53  ;;  %3022 = vmatprep.subr.mxu0 %v2566_v54 }
  0x3d   : > { %1108 = vperm.xlu1 %3468, %v2606_v40   ;;  %889 = vperm.xlu0 %3467, %v2582_v41   ;;  %v434_v40 = vmul.f32 %v3947_v33, %v420_v35 }
  0x3e   : > { %3068 = vmatprep.subr.mxu1 %v521_v57  ;;  %3023 = vmatpush3.msra.mxu0 %v2566_v54 }
  0x3f   : > { %3069 = vmatpush3.msra.mxu1 %v521_v57  ;;  %3024 = vmatprep.subr.mxu0 %v2565_v58 }
  0x40   : > { %3070 = vmatprep.subr.mxu1 %v520_v59  ;;  %3025 = vmatpush3.msra.mxu0 %v2565_v58 }
  0x41   : > { %1113 = vperm.xlu1 %3468, %v2607_v45   ;;  %894 = vperm.xlu0 %3467, %v2583_v46  }
  0x42   : > { %3071 = vmatpush3.msra.mxu1 %v520_v59  ;;  %3026 = vmatprep.subr.mxu0 %v2564_v62 }
  0x43   : > { %3027 = vmatpush3.msra.mxu0 %v2564_v62  ;;  %3128 = vmatprep.subr.mxu1 %v3829_v63  ;;  %v2749_v62 = vld [vmem:[%s4728_s4 + $0x208] sm:$0xff] }
  0x44   : > { %3084 = vmatprep.subr.mxu0 %v3834_v0 }
  0x45   : > { %1118 = vperm.xlu1 %3468, %v2608_v50   ;;  %899 = vperm.xlu0 %3467, %v2584_v51   ;;  %v545_v50 = vmul.f32 %v3947_v33, %v537_v43 }
  0x49   : > { %1123 = vperm.xlu1 %3468, %v2609_v55   ;;  %904 = vperm.xlu0 %3467, %v2585_v56   ;;  %v538_v55 = vld [vmem:[%s3955_s30 + $0x20] sm:$0xff] }
  0x4a   : > { %v422_v56 = vld [vmem:[%s3936_s11 + $0x20] sm:$0xff] }
  0x4d   : > { %1128 = vperm.xlu1 %3468, %v2610_v60   ;;  %909 = vperm.xlu0 %3467, %v2586_v61   ;;  %v2753_v61 = vld [vmem:[%s4728_s4 + $0x228] sm:$0xff] }
  0x51   : > { %1133 = vperm.xlu1 %3468, %v2611_v1   ;;  %914 = vperm.xlu0 %3467, %v2587_v2   ;;  %v546_v2 = vmul.f32 %v3947_v33, %v538_v55 }
  0x55   : > { %1536 = vperm.xlu1 %3468, %v2652_v3   ;;  %1317 = vperm.xlu0 %3467, %v2628_v4   ;;  %v436_v3 = vmul.f32 %v3947_v33, %v422_v56 }
  0x59   : > { %1541 = vperm.xlu1 %3468, %v2653_v5   ;;  %1322 = vperm.xlu0 %3467, %v2629_v6   ;;  %v539_v5 = vld [vmem:[%s3955_s30 + $0x30] sm:$0xff] }
  0x5d   : > { %1546 = vperm.xlu1 %3468, %v2654_v7   ;;  %1327 = vperm.xlu0 %3467, %v2630_v8   ;;  %v423_v8 = vld [vmem:[%s3936_s11 + $0x30] sm:$0xff] }
  0x61   : > { %1551 = vperm.xlu1 %3468, %v2655_v9   ;;  %1332 = vperm.xlu0 %3467, %v2631_v10   ;;  %v2626_v9 = vld [vmem:[%s4733_s9 + $0x1f0] sm:$0xff] }
  0x65   : > { %1556 = vperm.xlu1 %3468, %v2656_v11   ;;  %1337 = vperm.xlu0 %3467, %v2632_v12  }
  0x69   : > { %1561 = vperm.xlu1 %3468, %v2657_v13   ;;  %1342 = vperm.xlu0 %3467, %v2633_v14   ;;  %v547_v14 = vmul.f32 %v3947_v33, %v539_v5 }
  0x6d   : > { %1566 = vperm.xlu1 %3468, %v2658_v15   ;;  %1347 = vperm.xlu0 %3467, %v2634_v16   ;;  %v2754_v15 = vld [vmem:[%s4728_s4 + $0x230] sm:$0xff] }
  0x71   : > { %1571 = vperm.xlu1 %3468, %v2659_v17   ;;  %1352 = vperm.xlu0 %3467, %v2635_v18   ;;  %v437_v18 = vmul.f32 %v3947_v33, %v423_v8 }
  0x75   : > { %1976 = vperm.xlu1 %3468, %v2716_v19   ;;  %1756 = vperm.xlu0 %3467, %v2684_v20   ;;  %v2750_v19 = vld [vmem:[%s4728_s4 + $0x210] sm:$0xff] }
  0x76   : > { %v2602_v20 = vld [vmem:[%s4733_s9 + $0x170] sm:$0xff] }
  0x79   : > { %1981 = vperm.xlu1 %3468, %v2717_v21   ;;  %1761 = vperm.xlu0 %3467, %v2685_v22   ;;  %v540_v21 = vld [vmem:[%s3955_s30 + $0x40] sm:$0xff] }
  0x7d   : > { %1986 = vperm.xlu1 %3468, %v2718_v23   ;;  %1766 = vperm.xlu0 %3467, %v2686_v24   ;;  %v424_v23 = vld [vmem:[%s3936_s11 + $0x40] sm:$0xff] }
  0x81   : > { %1991 = vperm.xlu1 %3468, %v2719_v25   ;;  %1771 = vperm.xlu0 %3467, %v2687_v26  }
  0x85   : > { %1996 = vperm.xlu1 %3468, %v2720_v27   ;;  %1776 = vperm.xlu0 %3467, %v2688_v28   ;;  %v2601_v28 = vld [vmem:[%s4733_s9 + $0x168] sm:$0xff] }
  0x89   : > { %2001 = vperm.xlu1 %3468, %v2721_v29   ;;  %1781 = vperm.xlu0 %3467, %v2689_v30   ;;  %v2625_v29 = vld [vmem:[%s4733_s9 + $0x1e8] sm:$0xff]  ;;  %v548_v30 = vmul.f32 %v3947_v33, %v540_v21  ;;  %v2595_v21 = vld [vmem:[%s4733_s9 + $0x138] sm:$0xff] }
  0x8d   : > { %2006 = vperm.xlu1 %3468, %v2722_v31   ;;  %1786 = vperm.xlu0 %3467, %v2690_v32  }
  0x90   : > { %v464_v41 = vpop.permute.xlu1 %463  ;;  %v459_v42 = vpop.permute.xlu0 %458 }
  0x91   : > { %v497_v45 = vmul.f32 %v3960_v36, %v464_v41  ;;  %v496_v46 = vmul.f32 %v3960_v36, %v459_v42  ;;  %2011 = vperm.xlu1 %3468, %v2723_v37   ;;  %1791 = vperm.xlu0 %3467, %v2691_v38   ;;  %v2751_v38 = vld [vmem:[%s4728_s4 + $0x218] sm:$0xff] }
  0x93   : > { %v505_v49 = vadd.f32 %v497_v45, %v435_v39  ;;  %v504_v51 = vadd.f32 %v496_v46, %v434_v40  ;;  %v2600_v39 = vld [vmem:[%s4733_s9 + $0x160] sm:$0xff]  ;;  %v541_v40 = vld [vmem:[%s3955_s30 + $0x50] sm:$0xff] }
  0x94   : > { %v569_v53 = vpop.permute.xlu1 %568  ;;  %v564_v54 = vpop.permute.xlu0 %563  ;;  %v425_v45 = vld [vmem:[%s3936_s11 + $0x50] sm:$0xff] }
  0x95   : > { %v513_v57 = vmax.f32 %v505_v49, 0.0  ;;  %v602_v58 = vmul.f32 %v3960_v36, %v569_v53  ;;  %v601_v59 = vmul.f32 %v3960_v36, %v564_v54  ;;  %2215 = vperm.xlu1 %3468, %v2752_v47   ;;  %2195 = vperm.xlu0 %3467, %v2748_v48   ;;  %v512_v60 = vmax.f32 %v504_v51, 0.0  ;;  %v2599_v49 = vld [vmem:[%s4733_s9 + $0x158] sm:$0xff] }
  0x96   : > { %v2623_v51 = vld [vmem:[%s4733_s9 + $0x1d8] sm:$0xff]  ;;  %v439_v54 = vmul.f32 %v3947_v33, %v425_v45 }
  0x97   : > { %v610_v1 = vadd.f32 %v602_v58, %v545_v50  ;;  %3072 = vmatprep.mubr.f32.mxu1 %v512_v60  ;;  %v609_v4 = vadd.f32 %v601_v59, %v544_v52  ;;  %v549_v50 = vmul.f32 %v3947_v33, %v541_v40  ;;  %v542_v58 = vld [vmem:[%s3955_s30 + $0x60] sm:$0xff]  ;;  %v2622_v60 = vld [vmem:[%s4733_s9 + $0x1d0] sm:$0xff] }
  0x98   : > { %v574_v6 = vpop.permute.xlu1 %573  ;;  %v469_v7 = vpop.permute.xlu0 %468  ;;  %3073 = vmatmul.mubr.f32.vlgmr.msra.gmra.mxu1 %v513_v57  ;;  %v2598_v57 = vld [vmem:[%s4733_s9 + $0x150] sm:$0xff]  ;;  %v550_v5 = vmul.f32 %v3947_v33, %v542_v58 }
  0x99   : > { %v618_v10 = vmax.f32 %v610_v1, 0.0  ;;  %v603_v11 = vmul.f32 %v3960_v36, %v574_v6  ;;  %v498_v12 = vmul.f32 %v3960_v36, %v469_v7  ;;  %2220 = vperm.xlu1 %3468, %v2753_v61   ;;  %2200 = vperm.xlu0 %3467, %v2749_v62   ;;  %v617_v13 = vmax.f32 %v609_v4, 0.0  ;;  %v426_v61 = vld [vmem:[%s3936_s11 + $0x60] sm:$0xff]  ;;  %v2621_v7 = vld [vmem:[%s4733_s9 + $0x1c8] sm:$0xff] }
  0x9a   : > { %3129 = vmatpush3.msra.mxu1 %v3829_v63 }
  0x9b   : > { %v611_v16 = vadd.f32 %v603_v11, %v546_v2  ;;  %v506_v17 = vadd.f32 %v498_v12, %v436_v3  ;;  %3028 = vmatprep.mubr.f32.mxu0 %v617_v13  ;;  %3130 = vmatprep.subr.mxu1 %v2626_v9  ;;  %v2597_v3 = vld [vmem:[%s4733_s9 + $0x148] sm:$0xff]  ;;  %v2596_v11 = vld [vmem:[%s4733_s9 + $0x140] sm:$0xff]  ;;  %v543_v12 = vld [vmem:[%s3955_s30 + $0x70] sm:$0xff] }
  0x9c   : > { %v579_v63 = vpop.permute.xlu1 %578  ;;  %v474_v22 = vpop.permute.xlu0 %473  ;;  %3029 = vmatmul.mubr.f32.vlgmr.msra.gmra.mxu0 %v618_v10  ;;  %3131 = vmatpush3.msra.mxu1 %v2626_v9  ;;  %v440_v9 = vmul.f32 %v3947_v33, %v426_v61  ;;  %v2590_v61 = vld [vmem:[%s4733_s9 + $0x110] sm:$0xff] }
  0x9d   : > { %v619_v24 = vmax.f32 %v611_v16, 0.0  ;;  %v514_v25 = vmax.f32 %v506_v17, 0.0  ;;  %v604_v26 = vmul.f32 %v3960_v36, %v579_v63  ;;  %v499_v27 = vmul.f32 %v3960_v36, %v474_v22  ;;  %3085 = vmatpush3.msra.mxu0 %v3834_v0  ;;  %2225 = vperm.xlu1 %3468, %v2754_v15   ;;  %v427_v15 = vld [vmem:[%s3936_s11 + $0x70] sm:$0xff] }
  0x9e   : > { %2205 = vperm.xlu0 %3467, %v2750_v19   ;;  %3086 = vmatprep.subr.mxu0 %v2602_v20  ;;  %v438_v0 = vmul.f32 %v3947_v33, %v424_v23  ;;  %v551_v63 = vmul.f32 %v3947_v33, %v543_v12  ;;  %v2619_v23 = vld [vmem:[%s4733_s9 + $0x1b8] sm:$0xff] }
  0x9f   : > { %v612_v31 = vadd.f32 %v604_v26, %v547_v14  ;;  %v507_v32 = vadd.f32 %v499_v27, %v437_v18  ;;  %3087 = vmatpush3.msra.mxu0 %v2602_v20  ;;  %3031 = vmatprep.mubr.f32.mxu0 %v619_v24  ;;  %v2620_v14 = vld [vmem:[%s4733_s9 + $0x1c0] sm:$0xff]  ;;  %v441_v24 = vmul.f32 %v3947_v33, %v427_v15  ;;  %v2594_v26 = vld [vmem:[%s4733_s9 + $0x130] sm:$0xff] }
  0xa0   : > { %3075 = vmatprep.mubr.f32.mxu1 %v514_v25  ;;  %3088 = vmatprep.subr.mxu0 %v2601_v28  ;;  %v584_v35 = vpop.permute.xlu1 %583  ;;  %v479_v37 = vpop.permute.xlu0 %478  ;;  %v2588_v15 = vld [vmem:[%s4733_s9 + $0x100] sm:$0xff] }
  0xa1   : > { %v620_v41 = vmax.f32 %v612_v31, 0.0  ;;  %3132 = vmatprep.subr.mxu1 %v2625_v29  ;;  %v605_v42 = vmul.f32 %v3960_v36, %v584_v35  ;;  %v500_v43 = vmul.f32 %v3960_v36, %v479_v37  ;;  %3089 = vmatpush3.msra.mxu0 %v2601_v28  ;;  %v515_v46 = vmax.f32 %v507_v32, 0.0  ;;  %v2618_v28 = vld [vmem:[%s4733_s9 + $0x1b0] sm:$0xff]  ;;  %v852_v31 = vld [vmem:[%s3936_s11 + $0x1] sm:$0xff] }
  0xa2   : > { %3133 = vmatpush3.msra.mxu1 %v2625_v29  ;;  %2230 = vperm.xlu1 %3468, %v2755_v34   ;;  %v1071_v34 = vld [vmem:[%s4092_s12] sm:$0xff]  ;;  %v2593_v37 = vld [vmem:[%s4733_s9 + $0x128] sm:$0xff] }
  0xa3   : > { %v613_v47 = vadd.f32 %v605_v42, %v548_v30  ;;  %v508_v48 = vadd.f32 %v500_v43, %v438_v0  ;;  %2210 = vperm.xlu0 %3467, %v2751_v38   ;;  %3090 = vmatprep.subr.mxu0 %v2600_v39  ;;  %v2617_v38 = vld [vmem:[%s4733_s9 + $0x1a8] sm:$0xff]  ;;  %v2592_v43 = vld [vmem:[%s4733_s9 + $0x120] sm:$0xff] }
  0xa4   : > { %3134 = vmatprep.subr.mxu1 %v2624_v44  ;;  %3091 = vmatpush3.msra.mxu0 %v2600_v39  ;;  %v589_v52 = vpop.permute.xlu1 %588  ;;  %v484_v53 = vpop.permute.xlu0 %483  ;;  %v860_v39 = vmul.f32 %v3947_v33, %v852_v31  ;;  %v856_v31 = vld [vmem:[%s3936_s11 + $0x41] sm:$0xff] }
  0xa5   : > { %3135 = vmatpush3.msra.mxu1 %v2624_v44  ;;  %3032 = vmatmul.mubr.f32.gmra.mxu0 %v620_v41  ;;  %v606_v55 = vmul.f32 %v3960_v36, %v589_v52  ;;  %v501_v56 = vmul.f32 %v3960_v36, %v484_v53  ;;  %v621_v59 = vmax.f32 %v613_v47, 0.0  ;;  %v516_v62 = vmax.f32 %v508_v48, 0.0  ;;  %v2616_v48 = vld [vmem:[%s4733_s9 + $0x1a0] sm:$0xff]  ;;  %v2591_v52 = vld [vmem:[%s4733_s9 + $0x118] sm:$0xff] }
  0xa6   : > { %3076 = vmatmul.mubr.f32.gmra.mxu1 %v515_v46  ;;  %3092 = vmatprep.subr.mxu0 %v2599_v49  ;;  %v1079_v41 = vmul.f32 %v3947_v33, %v1071_v34  ;;  %v853_v46 = vld [vmem:[%s3936_s11 + $0x11] sm:$0xff]  ;;  %v1075_v34 = vld [vmem:[%s4092_s12 + $0x40] sm:$0xff] }
  0xa7   : > { %3136 = vmatprep.subr.mxu1 %v2623_v51  ;;  %v614_v1 = vadd.f32 %v606_v55, %v549_v50  ;;  %3093 = vmatpush3.msra.mxu0 %v2599_v49  ;;  %v509_v2 = vadd.f32 %v501_v56, %v439_v54  ;;  %v1072_v49 = vld [vmem:[%s4092_s12 + $0x10] sm:$0xff]  ;;  %v861_v53 = vmul.f32 %v3947_v33, %v853_v46  ;;  %v2615_v56 = vld [vmem:[%s4733_s9 + $0x198] sm:$0xff] }
  0xa8   : > { %3137 = vmatpush3.msra.mxu1 %v2623_v51  ;;  %3094 = vmatprep.subr.mxu0 %v2598_v57  ;;  %v594_v4 = vpop.permute.xlu1 %593  ;;  %v489_v6 = vpop.permute.xlu0 %488 }
  0xa9   : > { %3138 = vmatprep.subr.mxu1 %v2622_v60  ;;  %3095 = vmatpush3.msra.mxu0 %v2598_v57  ;;  %v607_v8 = vmul.f32 %v3960_v36, %v594_v4  ;;  %v502_v10 = vmul.f32 %v3960_v36, %v489_v6  ;;  %v622_v13 = vmax.f32 %v614_v1, 0.0  ;;  %v517_v16 = vmax.f32 %v509_v2, 0.0  ;;  %v2614_v1 = vld [vmem:[%s4733_s9 + $0x190] sm:$0xff]  ;;  %v1073_v2 = vld [vmem:[%s4092_s12 + $0x20] sm:$0xff] }
  0xaa   : > { %3139 = vmatpush3.msra.mxu1 %v2622_v60  ;;  %3034 = vmatprep.mubr.f32.mxu0 %v621_v59  ;;  %v1080_v57 = vmul.f32 %v3947_v33, %v1072_v49 }
  0xab   : > { %3078 = vmatprep.mubr.f32.mxu1 %v516_v62  ;;  %3096 = vmatprep.subr.mxu0 %v2597_v3  ;;  %v615_v17 = vadd.f32 %v607_v8, %v550_v5  ;;  %v510_v20 = vadd.f32 %v502_v10, %v440_v9  ;;  %v854_v62 = vld [vmem:[%s3936_s11 + $0x21] sm:$0xff] }
  0xac   : > { %3140 = vmatprep.subr.mxu1 %v2621_v7  ;;  %3097 = vmatpush3.msra.mxu0 %v2597_v3  ;;  %v599_v18 = vpop.permute.xlu1 %598  ;;  %v494_v19 = vpop.permute.xlu0 %493  ;;  %v2589_v5 = vld [vmem:[%s4733_s9 + $0x108] sm:$0xff]  ;;  %v862_v9 = vmul.f32 %v3947_v33, %v854_v62 }
  0xad   : > { %3141 = vmatpush3.msra.mxu1 %v2621_v7  ;;  %3098 = vmatprep.subr.mxu0 %v2596_v11  ;;  %v608_v22 = vmul.f32 %v3960_v36, %v599_v18  ;;  %v503_v25 = vmul.f32 %v3960_v36, %v494_v19  ;;  %v623_v27 = vmax.f32 %v615_v17, 0.0  ;;  %v518_v32 = vmax.f32 %v510_v20, 0.0  ;;  %v2613_v8 = vld [vmem:[%s4733_s9 + $0x188] sm:$0xff]  ;;  %v2612_v18 = vld [vmem:[%s4733_s9 + $0x180] sm:$0xff]  ;;  %v1074_v19 = vld [vmem:[%s4092_s12 + $0x30] sm:$0xff] }
  0xae   : > { %3142 = vmatprep.subr.mxu1 %v2620_v14  ;;  %3099 = vmatpush3.msra.mxu0 %v2596_v11 }
  0xaf   : > { %3143 = vmatpush3.msra.mxu1 %v2620_v14  ;;  %3035 = vmatmul.mubr.f32.gmra.mxu0 %v622_v13  ;;  %v616_v0 = vadd.f32 %v608_v22, %v551_v63  ;;  %v511_v35 = vadd.f32 %v503_v25, %v441_v24  ;;  %v1081_v13 = vmul.f32 %v3947_v33, %v1073_v2  ;;  %v2651_v24 = vld [vmem:[%s4733_s9 + $0x278] sm:$0xff] }
  0xb0   : > { %3079 = vmatmul.mubr.f32.gmra.mxu1 %v517_v16  ;;  %3100 = vmatprep.subr.mxu0 %v2595_v21  ;;  %v1099_v29 = vpop.permute.xlu1 %1098  ;;  %v880_v30 = vpop.permute.xlu0 %879  ;;  %v855_v16 = vld [vmem:[%s3936_s11 + $0x31] sm:$0xff] }
  0xb1   : > { %3144 = vmatprep.subr.mxu1 %v2619_v23  ;;  %3101 = vmatpush3.msra.mxu0 %v2595_v21  ;;  %v917_v40 = vmul.f32 %v3960_v36, %v880_v30  ;;  %v1136_v42 = vmul.f32 %v3960_v36, %v1099_v29  ;;  %v624_v47 = vmax.f32 %v616_v0, 0.0  ;;  %v519_v50 = vmax.f32 %v511_v35, 0.0  ;;  %v2650_v30 = vld [vmem:[%s4733_s9 + $0x270] sm:$0xff] }
  0xb2   : > { %3145 = vmatpush3.msra.mxu1 %v2619_v23  ;;  %3102 = vmatprep.subr.mxu0 %v2594_v26  ;;  %v863_v25 = vmul.f32 %v3947_v33, %v855_v16  ;;  %v2674_v0 = vld [vmem:[%s4733_s9 + $0x2f0] sm:$0xff]  ;;  %v2669_v16 = vld [vmem:[%s4733_s9 + $0x2c8] sm:$0xff] }
  0xb3   : > { %3146 = vmatprep.subr.mxu1 %v2618_v28  ;;  %3103 = vmatpush3.msra.mxu0 %v2594_v26  ;;  %v925_v51 = vadd.f32 %v917_v40, %v860_v39  ;;  %v1144_v55 = vadd.f32 %v1136_v42, %v1079_v41  ;;  %v2649_v41 = vld [vmem:[%s4733_s9 + $0x268] sm:$0xff]  ;;  %v864_v42 = vmul.f32 %v3947_v33, %v856_v31  ;;  %v2667_v31 = vld [vmem:[%s4733_s9 + $0x2b8] sm:$0xff] }
  0xb4   : > { %3147 = vmatpush3.msra.mxu1 %v2618_v28  ;;  %3037 = vmatprep.mubr.f32.mxu0 %v623_v27  ;;  %v1104_v44 = vpop.permute.xlu1 %1103  ;;  %v885_v45 = vpop.permute.xlu0 %884  ;;  %v2675_v27 = vld [vmem:[%s4733_s9 + $0x2f8] sm:$0xff]  ;;  %v1082_v28 = vmul.f32 %v3947_v33, %v1074_v19  ;;  %v2644_v19 = vld [vmem:[%s4733_s9 + $0x240] sm:$0xff] }
  0xb5   : > { %3081 = vmatprep.mubr.f32.mxu1 %v518_v32  ;;  %3104 = vmatprep.subr.mxu0 %v2593_v37  ;;  %v918_v54 = vmul.f32 %v3960_v36, %v885_v45  ;;  %v1137_v58 = vmul.f32 %v3960_v36, %v1104_v44  ;;  %v933_v3 = vmax.f32 %v925_v51, 0.0  ;;  %v1152_v6 = vmax.f32 %v1144_v55, 0.0  ;;  %v2673_v44 = vld [vmem:[%s4733_s9 + $0x2e8] sm:$0xff] }
  0xb6   : > { %3148 = vmatprep.subr.mxu1 %v2617_v38  ;;  %3105 = vmatpush3.msra.mxu0 %v2593_v37  ;;  %v1083_v45 = vmul.f32 %v3947_v33, %v1075_v34  ;;  %v2642_v34 = vld [vmem:[%s4733_s9 + $0x230] sm:$0xff] }
  0xb7   : > { %3149 = vmatpush3.msra.mxu1 %v2617_v38  ;;  %3106 = vmatprep.subr.mxu0 %v2592_v43  ;;  %v926_v4 = vadd.f32 %v918_v54, %v861_v53  ;;  %v1145_v7 = vadd.f32 %v1137_v58, %v1080_v57  ;;  %v1076_v53 = vld [vmem:[%s4092_s12 + $0x50] sm:$0xff]  ;;  %v2647_v57 = vld [vmem:[%s4733_s9 + $0x258] sm:$0xff] }
  0xb8   : > { %3150 = vmatprep.subr.mxu1 %v2616_v48  ;;  %3107 = vmatpush3.msra.mxu0 %v2592_v43  ;;  %v1109_v59 = vpop.permute.xlu1 %1108  ;;  %v890_v60 = vpop.permute.xlu0 %889 }
  0xb9   : > { %3151 = vmatpush3.msra.mxu1 %v2616_v48  ;;  %3038 = vmatmul.mubr.f32.gmra.mxu0 %v624_v47  ;;  %v919_v10 = vmul.f32 %v3960_v36, %v890_v60  ;;  %v1138_v14 = vmul.f32 %v3960_v36, %v1109_v59  ;;  %v934_v17 = vmax.f32 %v926_v4, 0.0  ;;  %v1153_v20 = vmax.f32 %v1145_v7, 0.0  ;;  %v2648_v47 = vld [vmem:[%s4733_s9 + $0x260] sm:$0xff]  ;;  %v4188_v48 = vld [vmem:[%s3936_s11 + $0x51] sm:$0xff] }
  0xba   : > { %3082 = vmatmul.mubr.f32.gmra.mxu1 %v519_v50  ;;  %3108 = vmatprep.subr.mxu0 %v2591_v52  ;;  %v865_v58 = vmul.f32 %v3947_v33, %v4188_v48  ;;  %v2671_v60 = vld [vmem:[%s4733_s9 + $0x2d8] sm:$0xff]  ;;  %v4209_v4 = vld [vmem:[%s3936_s11 + $0x61] sm:$0xff] }
  0xbb   : > { %3152 = vmatprep.subr.mxu1 %v2615_v56  ;;  %3109 = vmatpush3.msra.mxu0 %v2591_v52  ;;  %v927_v21 = vadd.f32 %v919_v10, %v862_v9  ;;  %v1146_v23 = vadd.f32 %v1138_v14, %v1081_v13  ;;  %v2672_v52 = vld [vmem:[%s4733_s9 + $0x2e0] sm:$0xff] }
  0xbc   : > { %3153 = vmatpush3.msra.mxu1 %v2615_v56  ;;  %3110 = vmatprep.subr.mxu0 %v2590_v61  ;;  %v1114_v11 = vpop.permute.xlu1 %1113  ;;  %v895_v12 = vpop.permute.xlu0 %894  ;;  %v1077_v7 = vld [vmem:[%s4092_s12 + $0x60] sm:$0xff] }
  0xbd   : > { %3154 = vmatprep.subr.mxu1 %v2614_v1  ;;  %3111 = vmatpush3.msra.mxu0 %v2590_v61  ;;  %v920_v26 = vmul.f32 %v3960_v36, %v895_v12  ;;  %v1139_v29 = vmul.f32 %v3960_v36, %v1114_v11  ;;  %v935_v32 = vmax.f32 %v927_v21, 0.0  ;;  %v1154_v38 = vmax.f32 %v1146_v23, 0.0  ;;  %v2645_v11 = vld [vmem:[%s4733_s9 + $0x248] sm:$0xff] }
  0xbe   : > { %3155 = vmatpush3.msra.mxu1 %v2614_v1  ;;  %3112 = vmatprep.subr.mxu0 %v2589_v5  ;;  %v1084_v61 = vmul.f32 %v3947_v33, %v1076_v53  ;;  %v866_v12 = vmul.f32 %v3947_v33, %v4209_v4  ;;  %v1291_v53 = vld [vmem:[%s4248_s18 + $0x10] sm:$0xff] }
  0xbf   : > { %3116 = vmatprep.mubr.f32.mxu0 %v933_v3  ;;  %3156 = vmatprep.subr.mxu1 %v2613_v8  ;;  %v928_v39 = vadd.f32 %v920_v26, %v863_v25  ;;  %v1147_v40 = vadd.f32 %v1139_v29, %v1082_v28  ;;  %v2646_v3 = vld [vmem:[%s4733_s9 + $0x250] sm:$0xff]  ;;  %v2643_v28 = vld [vmem:[%s4733_s9 + $0x238] sm:$0xff] }
  0xc0   : > { %3160 = vmatprep.mubr.f32.mxu1 %v1152_v6  ;;  %3113 = vmatpush3.msra.mxu0 %v2589_v5  ;;  %v1119_v63 = vpop.permute.xlu1 %1118  ;;  %v900_v22 = vpop.permute.xlu0 %899  ;;  %v2670_v6 = vld [vmem:[%s4733_s9 + $0x2d0] sm:$0xff] }
  0xc1   : > { %3157 = vmatpush3.msra.mxu1 %v2613_v8  ;;  %3114 = vmatprep.subr.mxu0 %v2588_v15  ;;  %v921_v43 = vmul.f32 %v3960_v36, %v900_v22  ;;  %v1140_v46 = vmul.f32 %v3960_v36, %v1119_v63  ;;  %v936_v51 = vmax.f32 %v928_v39, 0.0  ;;  %v1155_v54 = vmax.f32 %v1147_v40, 0.0  ;;  %v2668_v63 = vld [vmem:[%s4733_s9 + $0x2c0] sm:$0xff]  ;;  %v1078_v22 = vld [vmem:[%s4092_s12 + $0x70] sm:$0xff] }
  0xc2   : > { %3158 = vmatprep.subr.mxu1 %v2612_v18  ;;  %3115 = vmatpush3.msra.mxu0 %v2588_v15 }
  0xc3   : > { %3159 = vmatpush3.msra.mxu1 %v2612_v18  ;;  %3117 = vmatmul.mubr.f32.vlgmr.msra.gmra.mxu0 %v934_v17  ;;  %v929_v55 = vadd.f32 %v921_v43, %v864_v42  ;;  %v1148_v56 = vadd.f32 %v1140_v46, %v1083_v45  ;;  %v1085_v17 = vmul.f32 %v3947_v33, %v1077_v7  ;;  %v1509_v43 = vld [vmem:[%s4092_s12 + $0x1] sm:$0xff] }
  0xc4   : > { %3161 = vmatmul.mubr.f32.vlgmr.msra.gmra.mxu1 %v1153_v20  ;;  %3172 = vmatprep.subr.mxu0 %v2651_v24  ;;  %v1124_v35 = vpop.permute.xlu1 %1123  ;;  %v905_v37 = vpop.permute.xlu0 %904  ;;  %v4230_v20 = vld [vmem:[%s3936_s11 + $0x71] sm:$0xff]  ;;  %v2641_v45 = vld [vmem:[%s4733_s9 + $0x228] sm:$0xff] }
  0xc5   : > { %3216 = vmatprep.subr.mxu1 %v2675_v27  ;;  %3173 = vmatpush3.msra.mxu0 %v2651_v24  ;;  %v922_v59 = vmul.f32 %v3960_v36, %v905_v37  ;;  %v1141_v62 = vmul.f32 %v3960_v36, %v1124_v35  ;;  %v937_v5 = vmax.f32 %v929_v55, 0.0  ;;  %v1156_v8 = vmax.f32 %v1148_v56, 0.0  ;;  %v2666_v37 = vld [vmem:[%s4733_s9 + $0x2b0] sm:$0xff]  ;;  %v2665_v46 = vld [vmem:[%s4733_s9 + $0x2a8] sm:$0xff] }
  0xc6   : > { %3217 = vmatpush3.msra.mxu1 %v2675_v27  ;;  %3174 = vmatprep.subr.mxu0 %v2650_v30  ;;  %v867_v29 = vmul.f32 %v3947_v33, %v4230_v20 }
  0xc7   : > { %3218 = vmatprep.subr.mxu1 %v2674_v0  ;;  %3175 = vmatpush3.msra.mxu0 %v2650_v30  ;;  %v930_v9 = vadd.f32 %v922_v59, %v865_v58  ;;  %v1149_v10 = vadd.f32 %v1141_v62, %v1084_v61  ;;  %v1510_v58 = vld [vmem:[%s4092_s12 + $0x11] sm:$0xff]  ;;  %v1299_v62 = vmul.f32 %v3947_v33, %v1291_v53  ;;  %v2705_v53 = vld [vmem:[%s4733_s9 + $0x368] sm:$0xff] }
  0xc8   : > { %3219 = vmatpush3.msra.mxu1 %v2674_v0  ;;  %3119 = vmatprep.mubr.f32.mxu0 %v935_v32  ;;  %v1129_v49 = vpop.permute.xlu1 %1128  ;;  %v910_v50 = vpop.permute.xlu0 %909  ;;  %v1086_v32 = vmul.f32 %v3947_v33, %v1078_v22  ;;  %v2639_v61 = vld [vmem:[%s4733_s9 + $0x218] sm:$0xff] }
  0xc9   : > { %3163 = vmatprep.mubr.f32.mxu1 %v1154_v38  ;;  %3176 = vmatprep.subr.mxu0 %v2649_v41  ;;  %v923_v13 = vmul.f32 %v3960_v36, %v910_v50  ;;  %v1142_v18 = vmul.f32 %v3960_v36, %v1129_v49  ;;  %v938_v21 = vmax.f32 %v930_v9, 0.0  ;;  %v1157_v23 = vmax.f32 %v1149_v10, 0.0  ;;  %v1290_v38 = vld [vmem:[%s4248_s18] sm:$0xff]  ;;  %v2638_v9 = vld [vmem:[%s4733_s9 + $0x210] sm:$0xff] }
  0xca   : > { %3220 = vmatprep.subr.mxu1 %v2673_v44  ;;  %3177 = vmatpush3.msra.mxu0 %v2649_v41  ;;  %v1517_v50 = vmul.f32 %v3947_v33, %v1509_v43  ;;  %v1292_v10 = vld [vmem:[%s4248_s18 + $0x20] sm:$0xff] }
  0xcb   : > { %3221 = vmatpush3.msra.mxu1 %v2673_v44  ;;  %3178 = vmatprep.subr.mxu0 %v2648_v47  ;;  %v931_v24 = vadd.f32 %v923_v13, %v866_v12  ;;  %v1150_v27 = vadd.f32 %v1142_v18, %v1085_v17  ;;  %v1511_v12 = vld [vmem:[%s4092_s12 + $0x21] sm:$0xff] }
  0xcc   : > { %3222 = vmatprep.subr.mxu1 %v2672_v52  ;;  %3179 = vmatpush3.msra.mxu0 %v2648_v47  ;;  %v1134_v1 = vpop.permute.xlu1 %1133  ;;  %v915_v2 = vpop.permute.xlu0 %914  ;;  %v1298_v47 = vmul.f32 %v3947_v33, %v1290_v38  ;;  %v2661_v18 = vld [vmem:[%s4733_s9 + $0x288] sm:$0xff]  ;;  %v1294_v43 = vld [vmem:[%s4248_s18 + $0x40] sm:$0xff] }
  0xcd   : > { %3223 = vmatpush3.msra.mxu1 %v2672_v52  ;;  %3120 = vmatmul.mubr.f32.gmra.mxu0 %v936_v51  ;;  %v924_v30 = vmul.f32 %v3960_v36, %v915_v2  ;;  %v1143_v0 = vmul.f32 %v3960_v36, %v1134_v1  ;;  %v939_v35 = vmax.f32 %v931_v24, 0.0  ;;  %v1158_v41 = vmax.f32 %v1150_v27, 0.0  ;;  %v2640_v52 = vld [vmem:[%s4733_s9 + $0x220] sm:$0xff] }
  0xce   : > { %3164 = vmatmul.mubr.f32.gmra.mxu1 %v1155_v54  ;;  %3180 = vmatprep.subr.mxu0 %v2647_v57 }
  0xcf   : > { %3224 = vmatprep.subr.mxu1 %v2671_v60  ;;  %3181 = vmatpush3.msra.mxu0 %v2647_v57  ;;  %v932_v42 = vadd.f32 %v924_v30, %v867_v29  ;;  %v1151_v44 = vadd.f32 %v1143_v0, %v1086_v32  ;;  %v2664_v57 = vld [vmem:[%s4733_s9 + $0x2a0] sm:$0xff]  ;;  %v1512_v29 = vld [vmem:[%s4092_s12 + $0x31] sm:$0xff] }
  0xd0   : > { %3225 = vmatpush3.msra.mxu1 %v2671_v60  ;;  %3182 = vmatprep.subr.mxu0 %v2646_v3  ;;  %v1537_v14 = vpop.permute.xlu1 %1536  ;;  %v1318_v15 = vpop.permute.xlu0 %1317 }
  0xd1   : > { %3226 = vmatprep.subr.mxu1 %v2670_v6  ;;  %3183 = vmatpush3.msra.mxu0 %v2646_v3  ;;  %v1355_v49 = vmul.f32 %v3960_v36, %v1318_v15  ;;  %v1574_v51 = vmul.f32 %v3960_v36, %v1537_v14  ;;  %v940_v56 = vmax.f32 %v932_v42, 0.0  ;;  %v1159_v59 = vmax.f32 %v1151_v44, 0.0  ;;  %v2663_v3 = vld [vmem:[%s4733_s9 + $0x298] sm:$0xff]  ;;  %v2637_v15 = vld [vmem:[%s4733_s9 + $0x208] sm:$0xff]  ;;  %v2706_v42 = vld [vmem:[%s4733_s9 + $0x370] sm:$0xff] }
  0xd2   : > { %3227 = vmatpush3.msra.mxu1 %v2670_v6  ;;  %3122 = vmatprep.mubr.f32.mxu0 %v937_v5  ;;  %v1518_v5 = vmul.f32 %v3947_v33, %v1510_v58 }
  0xd3   : > { %3166 = vmatprep.mubr.f32.mxu1 %v1156_v8  ;;  %3184 = vmatprep.subr.mxu0 %v2645_v11  ;;  %v1363_v60 = vadd.f32 %v1355_v49, %v1298_v47  ;;  %v1582_v2 = vadd.f32 %v1574_v51, %v1517_v50 }
  0xd4   : > { %3228 = vmatprep.subr.mxu1 %v2669_v16  ;;  %3185 = vmatpush3.msra.mxu0 %v2645_v11  ;;  %v4236_v25 = vpop.permute.xlu1 %1541  ;;  %v1323_v26 = vpop.permute.xlu0 %1322  ;;  %v2662_v11 = vld [vmem:[%s4733_s9 + $0x290] sm:$0xff] }
  0xd5   : > { %3229 = vmatpush3.msra.mxu1 %v2669_v16  ;;  %3186 = vmatprep.subr.mxu0 %v2644_v19  ;;  %v1356_v1 = vmul.f32 %v3960_v36, %v1323_v26  ;;  %v1575_v6 = vmul.f32 %v3960_v36, %v4236_v25  ;;  %v1371_v13 = vmax.f32 %v1363_v60, 0.0  ;;  %v1590_v16 = vmax.f32 %v1582_v2, 0.0  ;;  %v2636_v25 = vld [vmem:[%s4733_s9 + $0x200] sm:$0xff]  ;;  %v1293_v26 = vld [vmem:[%s4248_s18 + $0x30] sm:$0xff] }
  0xd6   : > { %3230 = vmatprep.subr.mxu1 %v2668_v63  ;;  %3187 = vmatpush3.msra.mxu0 %v2644_v19  ;;  %v1300_v19 = vmul.f32 %v3947_v33, %v1292_v10  ;;  %v1295_v60 = vld [vmem:[%s4248_s18 + $0x50] sm:$0xff]  ;;  %v2736_v2 = vld [vmem:[%s4733_s9 + $0x3e0] sm:$0xff] }
  0xd7   : > { %3231 = vmatpush3.msra.mxu1 %v2668_v63  ;;  %3123 = vmatmul.mubr.f32.gmra.mxu0 %v938_v21  ;;  %v1364_v14 = vadd.f32 %v1356_v1, %v1299_v62  ;;  %v1583_v17 = vadd.f32 %v1575_v6, %v1518_v5 }
  0xd8   : > { %3167 = vmatmul.mubr.f32.gmra.mxu1 %v1157_v23  ;;  %3188 = vmatprep.subr.mxu0 %v2643_v28  ;;  %v4262_v39 = vpop.permute.xlu1 %1546  ;;  %v4264_v40 = vpop.permute.xlu0 %1327  ;;  %v1519_v23 = vmul.f32 %v3947_v33, %v1511_v12 }
  0xd9   : > { %3232 = vmatprep.subr.mxu1 %v2667_v31  ;;  %3189 = vmatpush3.msra.mxu0 %v2643_v28  ;;  %v1357_v21 = vmul.f32 %v3960_v36, %v4264_v40  ;;  %v1576_v24 = vmul.f32 %v3960_v36, %v4262_v39  ;;  %v1372_v27 = vmax.f32 %v1364_v14, 0.0  ;;  %v2660_v28 = vld [vmem:[%s4733_s9 + $0x280] sm:$0xff]  ;;  %v1591_v30 = vmax.f32 %v1583_v17, 0.0  ;;  %v2739_v39 = vld [vmem:[%s4733_s9 + $0x3f8] sm:$0xff] }
  0xda   : > { %3233 = vmatpush3.msra.mxu1 %v2667_v31  ;;  %3190 = vmatprep.subr.mxu0 %v2642_v34  ;;  %v1520_v40 = vmul.f32 %v3947_v33, %v1512_v29 }
  0xdb   : > { %3234 = vmatprep.subr.mxu1 %v2666_v37  ;;  %3191 = vmatpush3.msra.mxu0 %v2642_v34  ;;  %v1365_v31 = vadd.f32 %v1357_v21, %v1300_v19  ;;  %v1584_v34 = vadd.f32 %v1576_v24, %v1519_v23  ;;  %v2734_v19 = vld [vmem:[%s4733_s9 + $0x3d0] sm:$0xff]  ;;  %v1515_v21 = vld [vmem:[%s4092_s12 + $0x61] sm:$0xff] }
  0xdc   : > { %3235 = vmatpush3.msra.mxu1 %v2666_v37  ;;  %3125 = vmatprep.mubr.f32.mxu0 %v939_v35  ;;  %v4281_v54 = vpop.permute.xlu1 %1551  ;;  %v4283_v55 = vpop.permute.xlu0 %1332  ;;  %v2707_v35 = vld [vmem:[%s4733_s9 + $0x378] sm:$0xff]  ;;  %v1301_v37 = vmul.f32 %v3947_v33, %v1293_v26  ;;  %v2701_v24 = vld [vmem:[%s4733_s9 + $0x348] sm:$0xff] }
  0xdd   : > { %3169 = vmatprep.mubr.f32.mxu1 %v1158_v41  ;;  %3192 = vmatprep.subr.mxu0 %v2641_v45  ;;  %v1358_v38 = vmul.f32 %v3960_v36, %v4283_v55  ;;  %v1577_v41 = vmul.f32 %v3960_v36, %v4281_v54  ;;  %v1373_v44 = vmax.f32 %v1365_v31, 0.0  ;;  %v1592_v50 = vmax.f32 %v1584_v34, 0.0  ;;  %v1297_v31 = vld [vmem:[%s4248_s18 + $0x70] sm:$0xff] }
  0xde   : > { %3236 = vmatprep.subr.mxu1 %v2665_v46  ;;  %3193 = vmatpush3.msra.mxu0 %v2641_v45  ;;  %v2738_v45 = vld [vmem:[%s4733_s9 + $0x3f0] sm:$0xff]  ;;  %v1302_v54 = vmul.f32 %v3947_v33, %v1294_v43 }
  0xdf   : > { %3237 = vmatpush3.msra.mxu1 %v2665_v46  ;;  %3194 = vmatprep.subr.mxu0 %v2640_v52  ;;  %v1513_v46 = vld [vmem:[%s4092_s12 + $0x41] sm:$0xff]  ;;  %v1366_v51 = vadd.f32 %v1358_v38, %v1301_v37  ;;  %v1516_v37 = vld [vmem:[%s4092_s12 + $0x71] sm:$0xff] }
  0xe0   : > { %3238 = vmatprep.subr.mxu1 %v2664_v57  ;;  %3195 = vmatpush3.msra.mxu0 %v2640_v52  ;;  %v4300_v7 = vpop.permute.xlu1 %1556  ;;  %v4302_v8 = vpop.permute.xlu0 %1337  ;;  %v1585_v52 = vadd.f32 %v1577_v41, %v1520_v40  ;;  %v2699_v41 = vld [vmem:[%s4733_s9 + $0x338] sm:$0xff] }
  0xe1   : > { %3239 = vmatpush3.msra.mxu1 %v2664_v57  ;;  %3126 = vmatmul.mubr.f32.gmra.mxu0 %v940_v56  ;;  %v1359_v55 = vmul.f32 %v3960_v36, %v4302_v8  ;;  %v2737_v56 = vld [vmem:[%s4733_s9 + $0x3e8] sm:$0xff]  ;;  %v4376_v57 = vld [vmem:[%s4724_s0] ss:$0 sm:$0xff]  ;;  %v1578_v33 = vmul.f32 %v3960_v36, %v4300_v7  ;;  %v1374_v1 = vmax.f32 %v1366_v51, 0.0  ;;  %v2703_v7 = vld [vmem:[%s4733_s9 + $0x358] sm:$0xff] }
  0xe2   : > { %3170 = vmatmul.mubr.f32.gmra.mxu1 %v1159_v59  ;;  %3196 = vmatprep.subr.mxu0 %v2639_v61  ;;  %v1521_v58 = vmul.f32 %v4376_v57, %v1513_v46  ;;  %v2704_v59 = vld [vmem:[%s4733_s9 + $0x360] sm:$0xff]  ;;  %v1593_v36 = vmax.f32 %v1585_v52, 0.0  ;;  %v1303_v8 = vmul.f32 %v4376_v57, %v1295_v60  ;;  %v2676_v52 = vld [vmem:[%s3936_s11 + $0x10] sm:$0xff] }
  0xe3   : > { %3240 = vmatprep.subr.mxu1 %v2663_v3  ;;  %3197 = vmatpush3.msra.mxu0 %v2639_v61  ;;  %v1367_v5 = vadd.f32 %v1359_v55, %v1302_v54  ;;  %v1737_v60 = vmul.f32 %v4376_v57, %v2676_v52  ;;  %v2770_v52 = vld [vmem:[%s4733_s9 + $0x470] sm:$0xff] }
  0xe4   : > { %3241 = vmatpush3.msra.mxu1 %v2663_v3  ;;  %3198 = vmatprep.subr.mxu0 %v2638_v9  ;;  %v4321_v63 = vpop.permute.xlu1 %1561  ;;  %v4323_v22 = vpop.permute.xlu0 %1342  ;;  %v1514_v3 = vld [vmem:[%s4092_s12 + $0x51] sm:$0xff]  ;;  %v1586_v6 = vadd.f32 %v1578_v33, %v1521_v58  ;;  %v2697_v33 = vld [vmem:[%s4733_s9 + $0x328] sm:$0xff]  ;;  %s3475_s12 = sshll.u32 %s3534_s27, 4  ;;  %s3476_s12 = int_to_ptr.vmem [resolvable:$false] %s3475_s12 }
  0xe5   : > { %3242 = vmatprep.subr.mxu1 %v2662_v11  ;;  %3199 = vmatpush3.msra.mxu0 %v2638_v9  ;;  %v4400_v9 = vld [vmem:[%s4725_s1] ss:$0 sm:$0xff]  ;;  %v1522_v12 = vmul.f32 %v4376_v57, %v1514_v3  ;;  %s3477_s20 = scalar_lea.vmem %s3476_s12, 2048 }
  0xe6   : > { %3243 = vmatpush3.msra.mxu1 %v2662_v11  ;;  %3200 = vmatprep.subr.mxu0 %v2637_v15  ;;  %v1360_v10 = vmul.f32 %v4400_v9, %v4323_v22  ;;  %v2735_v11 = vld [vmem:[%s4733_s9 + $0x3d8] sm:$0xff] }
  0xe7   : > { %3204 = vmatprep.mubr.f32.mxu0 %v1371_v13  ;;  %3244 = vmatprep.subr.mxu1 %v2661_v18  ;;  %v1579_v13 = vmul.f32 %v4400_v9, %v4321_v63  ;;  %v1594_v63 = vmax.f32 %v1586_v6, 0.0 }
  0xe8   : > { %3248 = vmatprep.mubr.f32.mxu1 %v1590_v16  ;;  %3201 = vmatpush3.msra.mxu0 %v2637_v15  ;;  %v4336_v32 = vpop.permute.xlu1 %1566  ;;  %v4338_v0 = vpop.permute.xlu0 %1347  ;;  %v2702_v15 = vld [vmem:[%s4733_s9 + $0x350] sm:$0xff]  ;;  %v1296_v16 = vld [vmem:[%s4248_s18 + $0x60] sm:$0xff]  ;;  %v1368_v22 = vadd.f32 %v1360_v10, %v1303_v8 }
  0xe9   : > { %3245 = vmatpush3.msra.mxu1 %v2661_v18  ;;  %3202 = vmatprep.subr.mxu0 %v2636_v25  ;;  %v1375_v18 = vmax.f32 %v1367_v5, 0.0  ;;  %v1587_v23 = vadd.f32 %v1579_v13, %v1522_v12  ;;  %v1361_v26 = vmul.f32 %v4400_v9, %v4338_v0  ;;  %v1580_v29 = vmul.f32 %v4400_v9, %v4336_v32  ;;  %v2677_v5 = vld [vmem:[%s3936_s11 + $0x20] sm:$0xff] }
  0xea   : > { %3246 = vmatprep.subr.mxu1 %v2660_v28  ;;  %3203 = vmatpush3.msra.mxu0 %v2636_v25  ;;  %v1304_v25 = vmul.f32 %v4376_v57, %v1296_v16  ;;  %v1376_v0 = vmax.f32 %v1368_v22, 0.0  ;;  %v1738_v12 = vmul.f32 %v4376_v57, %v2677_v5  ;;  %v2726_v22 = vld [vmem:[%s4733_s9 + $0x390] sm:$0xff]  ;;  %v2681_v5 = vld [vmem:[%s3936_s11 + $0x60] sm:$0xff] }
  0xeb   : > { %3247 = vmatpush3.msra.mxu1 %v2660_v28  ;;  %3205 = vmatmul.mubr.f32.vlgmr.msra.gmra.mxu0 %v1372_v27  ;;  %v2733_v27 = vld [vmem:[%s4733_s9 + $0x3c8] sm:$0xff]  ;;  %v1523_v28 = vmul.f32 %v4376_v57, %v1515_v21  ;;  %v1595_v32 = vmax.f32 %v1587_v23, 0.0  ;;  %v2710_v23 = vld [vmem:[%s3955_s30 + $0x30] sm:$0xff] }
  0xec   : > { %3249 = vmatmul.mubr.f32.vlgmr.msra.gmra.mxu1 %v1591_v30  ;;  %3260 = vmatprep.subr.mxu0 %v2707_v35  ;;  %v4360_v47 = vpop.permute.xlu1 %1571  ;;  %v4362_v49 = vpop.permute.xlu0 %1352  ;;  %v2700_v30 = vld [vmem:[%s4733_s9 + $0x340] sm:$0xff] }
  0xed   : > { %3304 = vmatprep.subr.mxu1 %v2739_v39  ;;  %3261 = vmatpush3.msra.mxu0 %v2707_v35  ;;  %v2732_v35 = vld [vmem:[%s4733_s9 + $0x3c0] sm:$0xff]  ;;  %v1588_v40 = vadd.f32 %v1580_v29, %v1523_v28  ;;  %v1362_v43 = vmul.f32 %v4400_v9, %v4362_v49  ;;  %v1581_v46 = vmul.f32 %v4400_v9, %v4360_v47  ;;  %v2730_v49 = vld [vmem:[%s4733_s9 + $0x3b0] sm:$0xff]  ;;  %v2725_v28 = vld [vmem:[%s4733_s9 + $0x388] sm:$0xff] }
  0xee   : > { %3305 = vmatpush3.msra.mxu1 %v2739_v39  ;;  %3262 = vmatprep.subr.mxu0 %v2706_v42  ;;  %v1369_v39 = vadd.f32 %v1361_v26, %v1304_v25  ;;  %v2708_v47 = vld [vmem:[%s3955_s30 + $0x10] sm:$0xff] }
  0xef   : > { %3306 = vmatprep.subr.mxu1 %v2738_v45  ;;  %3263 = vmatpush3.msra.mxu0 %v2706_v42  ;;  %v1305_v42 = vmul.f32 %v4376_v57, %v1297_v31  ;;  %v1596_v54 = vmax.f32 %v1588_v40, 0.0 }
  0xf0   : > { %3307 = vmatpush3.msra.mxu1 %v2738_v45  ;;  %3207 = vmatprep.mubr.f32.mxu0 %v1373_v44  ;;  %v4385_v61 = vpop.permute.xlu1 %1976  ;;  %v4387_v62 = vpop.permute.xlu0 %1756  ;;  %v2731_v44 = vld [vmem:[%s4733_s9 + $0x3b8] sm:$0xff]  ;;  %v1524_v45 = vmul.f32 %v4376_v57, %v1516_v37  ;;  %v1377_v51 = vmax.f32 %v1369_v39, 0.0  ;;  %v2679_v39 = vld [vmem:[%s3936_s11 + $0x40] sm:$0xff] }
  0xf1   : > { %3251 = vmatprep.mubr.f32.mxu1 %v1592_v50  ;;  %3264 = vmatprep.subr.mxu0 %v2705_v53  ;;  %v2698_v50 = vld [vmem:[%s4733_s9 + $0x330] sm:$0xff]  ;;  %v1370_v55 = vadd.f32 %v1362_v43, %v1305_v42  ;;  %v2014_v3 = vmul.f32 %v4400_v9, %v4385_v61  ;;  %v2695_v61 = vld [vmem:[%s4733_s9 + $0x318] sm:$0xff] }
  0xf2   : > { %3308 = vmatprep.subr.mxu1 %v2737_v56  ;;  %3265 = vmatpush3.msra.mxu0 %v2705_v53  ;;  %v1589_v58 = vadd.f32 %v1581_v46, %v1524_v45  ;;  %v1740_v45 = vmul.f32 %v4376_v57, %v2679_v39 }
  0xf3   : > { %3309 = vmatpush3.msra.mxu1 %v2737_v56  ;;  %3266 = vmatprep.subr.mxu0 %v2704_v59  ;;  %v1378_v6 = vmax.f32 %v1370_v55, 0.0 }
  0xf4   : > { %3310 = vmatprep.subr.mxu1 %v2736_v2  ;;  %3267 = vmatpush3.msra.mxu0 %v2704_v59  ;;  %v4410_v14 = vpop.permute.xlu0 %1761  ;;  %v4416_v17 = vpop.permute.xlu1 %1981  ;;  %v2729_v59 = vld [vmem:[%s4733_s9 + $0x3a8] sm:$0xff]  ;;  %v1597_v8 = vmax.f32 %v1589_v58, 0.0 }
  0xf5   : > { %3311 = vmatpush3.msra.mxu1 %v2736_v2  ;;  %3208 = vmatmul.mubr.f32.gmra.mxu0 %v1374_v1  ;;  %v1794_v1 = vmul.f32 %v4400_v9, %v4387_v62  ;;  %v1957_v2 = vmul.f32 %v4376_v57, %v2708_v47  ;;  %v2709_v62 = vld [vmem:[%s3955_s30 + $0x20] sm:$0xff]  ;;  %v1795_v13 = vmul.f32 %v4400_v9, %v4410_v14  ;;  %v2694_v14 = vld [vmem:[%s4733_s9 + $0x310] sm:$0xff] }
  0xf6   : > { %3252 = vmatmul.mubr.f32.gmra.mxu1 %v1593_v36  ;;  %3268 = vmatprep.subr.mxu0 %v2703_v7  ;;  %v2696_v36 = vld [vmem:[%s4733_s9 + $0x320] sm:$0xff]  ;;  %v2015_v21 = vmul.f32 %v4400_v9, %v4416_v17  ;;  %v2693_v17 = vld [vmem:[%s4733_s9 + $0x308] sm:$0xff] }
  0xf7   : > { %3312 = vmatprep.subr.mxu1 %v2735_v11  ;;  %3269 = vmatpush3.msra.mxu0 %v2703_v7  ;;  %v2728_v7 = vld [vmem:[%s4733_s9 + $0x3a0] sm:$0xff]  ;;  %v2022_v16 = vadd.f32 %v2014_v3, %v1957_v2  ;;  %v1803_v25 = vadd.f32 %v1795_v13, %v1738_v12  ;;  %v2767_v12 = vld [vmem:[%s4733_s9 + $0x458] sm:$0xff]  ;;  %v1742_v13 = vmul.f32 %v4376_v57, %v2681_v5 }
  0xf8   : > { %3313 = vmatpush3.msra.mxu1 %v2735_v11  ;;  %3270 = vmatprep.subr.mxu0 %v2702_v15  ;;  %v4438_v34 = vpop.permute.xlu0 %1766  ;;  %v4444_v38 = vpop.permute.xlu1 %1986  ;;  %v1802_v11 = vadd.f32 %v1794_v1, %v1737_v60  ;;  %v2181_v5 = vmul.f32 %v4376_v57, %v4209_v4 }
  0xf9   : > { %3314 = vmatprep.subr.mxu1 %v2734_v19  ;;  %3271 = vmatpush3.msra.mxu0 %v2702_v15  ;;  %v2030_v26 = vmax.f32 %v2022_v16, 0.0  ;;  %v1811_v40 = vmax.f32 %v1803_v25, 0.0 }
  0xfa   : > { %3315 = vmatpush3.msra.mxu1 %v2734_v19  ;;  %3210 = vmatprep.mubr.f32.mxu0 %v1375_v18  ;;  %v2727_v18 = vld [vmem:[%s4733_s9 + $0x398] sm:$0xff]  ;;  %v1958_v19 = vmul.f32 %v4376_v57, %v2709_v62  ;;  %v2713_v62 = vld [vmem:[%s3955_s30 + $0x60] sm:$0xff] }
  0xfb   : > { %3254 = vmatprep.mubr.f32.mxu1 %v1594_v63  ;;  %3272 = vmatprep.subr.mxu0 %v2701_v24  ;;  %v2678_v63 = vld [vmem:[%s3936_s11 + $0x30] sm:$0xff]  ;;  %v1962_v16 = vmul.f32 %v4376_v57, %v2713_v62 }
  0xfc   : > { %3316 = vmatprep.subr.mxu1 %v2733_v27  ;;  %3273 = vmatpush3.msra.mxu0 %v2701_v24  ;;  %v4465_v53 = vpop.permute.xlu0 %1771  ;;  %v4468_v56 = vpop.permute.xlu1 %1991  ;;  %v1810_v24 = vmax.f32 %v1802_v11, 0.0  ;;  %v1739_v29 = vmul.f32 %v4376_v57, %v2678_v63  ;;  %v2714_v63 = vld [vmem:[%s3955_s30 + $0x70] sm:$0xff] }
  0xfd   : > { %3317 = vmatpush3.msra.mxu1 %v2733_v27  ;;  %3274 = vmatprep.subr.mxu0 %v2700_v30  ;;  %v2023_v27 = vadd.f32 %v2015_v21, %v1958_v19  ;;  %v1797_v46 = vmul.f32 %v4400_v9, %v4465_v53  ;;  %v2712_v53 = vld [vmem:[%s3955_s30 + $0x50] sm:$0xff] }
  0xfe   : > { %3318 = vmatprep.subr.mxu1 %v2732_v35  ;;  %3275 = vmatpush3.msra.mxu0 %v2700_v30  ;;  %v1796_v30 = vmul.f32 %v4400_v9, %v4438_v34  ;;  %v2724_v34 = vld [vmem:[%s4733_s9 + $0x380] sm:$0xff]  ;;  %v1961_v2 = vmul.f32 %v4376_v57, %v2712_v53  ;;  %v2766_v19 = vld [vmem:[%s4733_s9 + $0x450] sm:$0xff] }
  0xff   : > { %3319 = vmatpush3.msra.mxu1 %v2732_v35  ;;  %3211 = vmatmul.mubr.f32.gmra.mxu0 %v1376_v0  ;;  %v1959_v0 = vmul.f32 %v4376_v57, %v2710_v23  ;;  %v2016_v35 = vmul.f32 %v4400_v9, %v4444_v38  ;;  %v2031_v42 = vmax.f32 %v2023_v27, 0.0  ;;  %v2682_v21 = vld [vmem:[%s3936_s11 + $0x70] sm:$0xff] }
 0x100   : > { %3255 = vmatmul.mubr.f32.gmra.mxu1 %v1595_v32  ;;  %3276 = vmatprep.subr.mxu0 %v2699_v41  ;;  %v4490_v10 = vpop.permute.xlu0 %1776  ;;  %v4498_v15 = vpop.permute.xlu1 %1996  ;;  %v2692_v32 = vld [vmem:[%s4733_s9 + $0x300] sm:$0xff]  ;;  %v1804_v38 = vadd.f32 %v1796_v30, %v1739_v29  ;;  %v1743_v27 = vmul.f32 %v4376_v57, %v2682_v21  ;;  %v1963_v29 = vmul.f32 %v4376_v57, %v2714_v63 }
 0x101   : > { %3320 = vmatprep.subr.mxu1 %v2731_v44  ;;  %3277 = vmatpush3.msra.mxu0 %v2699_v41  ;;  %v2711_v41 = vld [vmem:[%s3955_s30 + $0x40] sm:$0xff]  ;;  %v2024_v43 = vadd.f32 %v2016_v35, %v1959_v0  ;;  %v1798_v1 = vmul.f32 %v4400_v9, %v4490_v10  ;;  %v2018_v3 = vmul.f32 %v4400_v9, %v4498_v15 }
 0x102   : > { %3321 = vmatpush3.msra.mxu1 %v2731_v44  ;;  %3278 = vmatprep.subr.mxu0 %v2698_v50  ;;  %v2771_v44 = vld [vmem:[%s4733_s9 + $0x478] sm:$0xff]  ;;  %v1812_v47 = vmax.f32 %v1804_v38, 0.0  ;;  %v2683_v0 = vld [vmem:[%s3936_s11 + $0x80] sm:$0xff] }
 0x103   : > { %3322 = vmatprep.subr.mxu1 %v2730_v49  ;;  %3279 = vmatpush3.msra.mxu0 %v2698_v50  ;;  %v1960_v50 = vmul.f32 %v4376_v57, %v2711_v41  ;;  %v2032_v58 = vmax.f32 %v2024_v43, 0.0  ;;  %v2763_v41 = vld [vmem:[%s4733_s9 + $0x438] sm:$0xff] }
 0x104   : > { %3323 = vmatpush3.msra.mxu1 %v2730_v49  ;;  %3213 = vmatprep.mubr.f32.mxu0 %v1377_v51  ;;  %v4523_v31 = vpop.permute.xlu0 %1781  ;;  %v4528_v37 = vpop.permute.xlu1 %2001  ;;  %v2017_v51 = vmul.f32 %v4400_v9, %v4468_v56 }
 0x105   : > { %3257 = vmatprep.mubr.f32.mxu1 %v1596_v54  ;;  %3280 = vmatprep.subr.mxu0 %v2697_v33  ;;  %v2680_v54 = vld [vmem:[%s3936_s11 + $0x50] sm:$0xff]  ;;  %v1799_v15 = vmul.f32 %v4400_v9, %v4523_v31  ;;  %v2764_v31 = vld [vmem:[%s4733_s9 + $0x440] sm:$0xff] }
 0x106   : > { %3324 = vmatprep.subr.mxu1 %v2729_v59  ;;  %3281 = vmatpush3.msra.mxu0 %v2697_v33  ;;  %v1805_v33 = vadd.f32 %v1797_v46, %v1740_v45  ;;  %v2025_v56 = vadd.f32 %v2017_v51, %v1960_v50  ;;  %v1741_v60 = vmul.f32 %v4376_v57, %v2680_v54  ;;  %v2762_v46 = vld [vmem:[%s4733_s9 + $0x430] sm:$0xff] }
 0x107   : > { %3325 = vmatpush3.msra.mxu1 %v2729_v59  ;;  %3282 = vmatprep.subr.mxu0 %v2696_v36  ;;  %v2769_v59 = vld [vmem:[%s4733_s9 + $0x468] sm:$0xff]  ;;  %v2740_v51 = vld [vmem:[%s3936_s11 + $0x11] sm:$0xff] }
 0x108   : > { %3326 = vmatprep.subr.mxu1 %v2728_v7  ;;  %3283 = vmatpush3.msra.mxu0 %v2696_v36  ;;  %v4547_v49 = vpop.permute.xlu0 %1786  ;;  %v4553_v55 = vpop.permute.xlu1 %2006  ;;  %v2768_v36 = vld [vmem:[%s4733_s9 + $0x460] sm:$0xff]  ;;  %v2033_v10 = vmax.f32 %v2025_v56, 0.0  ;;  %v1806_v11 = vadd.f32 %v1798_v1, %v1741_v60  ;;  %v2176_v53 = vmul.f32 %v4376_v57, %v2740_v51 }
 0x109   : > { %3327 = vmatpush3.msra.mxu1 %v2728_v7  ;;  %3214 = vmatmul.mubr.f32.gmra.mxu0 %v1378_v6  ;;  %v1813_v7 = vmax.f32 %v1805_v33, 0.0  ;;  %v2020_v30 = vmul.f32 %v4400_v9, %v4553_v55  ;;  %v2761_v55 = vld [vmem:[%s4733_s9 + $0x428] sm:$0xff]  ;;  %v2760_v1 = vld [vmem:[%s4733_s9 + $0x420] sm:$0xff] }
 0x10a   : > { %3258 = vmatmul.mubr.f32.gmra.mxu1 %v1597_v8  ;;  %3284 = vmatprep.subr.mxu0 %v2695_v61  ;;  %v2741_v33 = vld [vmem:[%s3936_s11 + $0x21] sm:$0xff] }
 0x10b   : > { %3328 = vmatprep.subr.mxu1 %v2727_v18  ;;  %3285 = vmatpush3.msra.mxu0 %v2695_v61  ;;  %v2026_v61 = vadd.f32 %v2018_v3, %v1961_v2  ;;  %v2742_v2 = vld [vmem:[%s3936_s11 + $0x31] sm:$0xff] }
 0x10c   : > { %3329 = vmatpush3.msra.mxu1 %v2727_v18  ;;  %3286 = vmatprep.subr.mxu0 %v2694_v14  ;;  %v1792_v6 = vpop.permute.xlu0 %1791  ;;  %v2012_v8 = vpop.permute.xlu1 %2011  ;;  %v2019_v18 = vmul.f32 %v4400_v9, %v4528_v37  ;;  %v2715_v37 = vld [vmem:[%s3955_s30 + $0x80] sm:$0xff]  ;;  %s2447_s30 = sshll.u32 %s397_s28, 4  ;;  %s4680_s30 = int_to_ptr.vmem [resolvable:$true] %s2447_s30 }
 0x10d   : > { %3330 = vmatprep.subr.mxu1 %v2726_v22  ;;  %3287 = vmatpush3.msra.mxu0 %v2694_v14  ;;  %v1814_v14 = vmax.f32 %v1806_v11, 0.0  ;;  %v2034_v23 = vmax.f32 %v2026_v61, 0.0  ;;  %v1801_v38 = vmul.f32 %v4400_v9, %v1792_v6  ;;  %v2021_v45 = vmul.f32 %v4400_v9, %v2012_v8  ;;  %s3471_s18 = scalar_lea.vmem %s4680_s30, 1024  ;;  %p3478_p0 = scmp.lt.s32.totalorder %s4680_s30, %s3476_s12 }
 0x10e   : > { %3331 = vmatpush3.msra.mxu1 %v2726_v22  ;;  %3288 = vmatprep.subr.mxu0 %v2693_v17  ;;  %v2178_v8 = vmul.f32 %v4376_v57, %v2742_v2  ;;  %p3472_p11 = scmp.ne.s32.totalorder %s4680_s30, %s3471_s18  ;;  %p3479_p1 = scmp.lt.s32.totalorder %s3477_s20, %s3471_s18 }
 0x10f   : > { %3292 = vmatprep.mubr.f32.mxu0 %v1810_v24  ;;  %3332 = vmatprep.subr.mxu1 %v2725_v28  ;;  %v1807_v24 = vadd.f32 %v1799_v15, %v1742_v13  ;;  %v2743_v13 = vld [vmem:[%s3936_s11 + $0x41] sm:$0xff]  ;;  %v2758_v15 = vld [vmem:[%s4733_s9 + $0x410] sm:$0xff] }
 0x110   : > { %3336 = vmatprep.mubr.f32.mxu1 %v2030_v26  ;;  %3289 = vmatpush3.msra.mxu0 %v2693_v17  ;;  %v2196_v22 = vpop.permute.xlu0 %2195  ;;  %v2216_v25 = vpop.permute.xlu1 %2215  ;;  %v2027_v17 = vadd.f32 %v2019_v18, %v1962_v16  ;;  %v2765_v26 = vld [vmem:[%s4733_s9 + $0x448] sm:$0xff]  ;;  %v2182_v16 = vmul.f32 %v4376_v57, %v4230_v20  ;;  %p3473_p12 = pnand %p3472_p11, %p3630_p5  ;;  %p3480_p2 = por %p3479_p1, %p3478_p0 }
 0x111   : > { %3333 = vmatpush3.msra.mxu1 %v2725_v28  ;;  %3290 = vmatprep.subr.mxu0 %v2692_v32  ;;  %v1800_v28 = vmul.f32 %v4400_v9, %v4547_v49  ;;  %v1815_v35 = vmax.f32 %v1807_v24, 0.0  ;;  %v2237_v60 = vmul.f32 %v4400_v9, %v2216_v25 }
 0x112   : > { %3334 = vmatprep.subr.mxu1 %v2724_v34  ;;  %3291 = vmatpush3.msra.mxu0 %v2692_v32  ;;  %v2035_v32 = vmax.f32 %v2027_v17, 0.0  ;;  %p3474_p13 = pneg %p3473_p12 }
 0x113   : > { %3335 = vmatpush3.msra.mxu1 %v2724_v34  ;;  %3293 = vmatmul.mubr.f32.vlgmr.msra.gmra.mxu0 %v1811_v40  ;;  %v1808_v39 = vadd.f32 %v1800_v28, %v1743_v27  ;;  %v2028_v34 = vadd.f32 %v2020_v30, %v1963_v29  ;;  %v2756_v28 = vld [vmem:[%s4733_s9 + $0x400] sm:$0xff] }
 0x114   : > { %3337 = vmatmul.mubr.f32.vlgmr.msra.gmra.mxu1 %v2031_v42  ;;  %3348 = vmatprep.subr.mxu0 %v2771_v44  ;;  %v2201_v40 = vpop.permute.xlu0 %2200  ;;  %v1744_v42 = vmul.f32 %v4376_v57, %v2683_v0  ;;  %v2221_v43 = vpop.permute.xlu1 %2220  ;;  %p3481_p3 = pnand %p3480_p2, %p3474_p13 }
 0x115   : > { %3392 = vmatprep.subr.mxu1 %v2771_v44  ;;  %3349 = vmatpush3.msra.mxu0 %v2771_v44  ;;  %v1816_v50 = vmax.f32 %v1808_v39, 0.0  ;;  %v2036_v49 = vmax.f32 %v2028_v34, 0.0  ;;  %v2234_v62 = vmul.f32 %v4400_v9, %v2201_v40  ;;  %v2238_v61 = vmul.f32 %v4400_v9, %v2221_v43 }
 0x116   : > { %3408 = vmatpush3.msra.mxu1 %v2771_v44  ;;  %3350 = vmatprep.subr.mxu0 %v2770_v52  ;;  %v1964_v44 = vmul.f32 %v4376_v57, %v2715_v37 }
 0x117   : > { %3393 = vmatprep.subr.mxu1 %v2770_v52  ;;  %3351 = vmatpush3.msra.mxu0 %v2770_v52  ;;  %v2246_v25 = vadd.f32 %v2238_v61, %v2181_v5 }
 0x118   : > { %3409 = vmatpush3.msra.mxu1 %v2770_v52  ;;  %3295 = vmatprep.mubr.f32.mxu0 %v1812_v47  ;;  %v1809_v52 = vadd.f32 %v1801_v38, %v1744_v42  ;;  %v2029_v54 = vadd.f32 %v2021_v45, %v1964_v44  ;;  %v2226_v56 = vpop.permute.xlu1 %2225 }
 0x119   : > { %3339 = vmatprep.mubr.f32.mxu1 %v2032_v58  ;;  %3352 = vmatprep.subr.mxu0 %v2769_v59  ;;  %v2206_v47 = vpop.permute.xlu0 %2205  ;;  %v2233_v58 = vmul.f32 %v4400_v9, %v2196_v22  ;;  %v2239_v18 = vmul.f32 %v4400_v9, %v2226_v56  ;;  %v2757_v22 = vld [vmem:[%s4733_s9 + $0x408] sm:$0xff]  ;;  %v2254_v30 = vmax.f32 %v2246_v25, 0.0 }
 0x11a   : > { %3394 = vmatprep.subr.mxu1 %v2769_v59  ;;  %3353 = vmatpush3.msra.mxu0 %v2769_v59  ;;  %v1817_v3 = vmax.f32 %v1809_v52, 0.0  ;;  %v2235_v4 = vmul.f32 %v4400_v9, %v2206_v47 }
 0x11b   : > { %3410 = vmatpush3.msra.mxu1 %v2769_v59  ;;  %3354 = vmatprep.subr.mxu0 %v2768_v36  ;;  %v2180_v59 = vmul.f32 %v4376_v57, %v4188_v48  ;;  %v2177_v48 = vmul.f32 %v4376_v57, %v2741_v33  ;;  %v2241_v6 = vadd.f32 %v2233_v58, %v2176_v53 }
 0x11c   : > { %3395 = vmatprep.subr.mxu1 %v2768_v36  ;;  %3355 = vmatpush3.msra.mxu0 %v2768_v36  ;;  %v2243_v17 = vadd.f32 %v2235_v4, %v2178_v8  ;;  %v2247_v27 = vadd.f32 %v2239_v18, %v2182_v16 }
 0x11d   : > { %3411 = vmatpush3.msra.mxu1 %v2768_v36  ;;  %3296 = vmatmul.mubr.f32.gmra.mxu0 %v1813_v7  ;;  %v2037_v36 = vmax.f32 %v2029_v54, 0.0  ;;  %v2759_v7 = vld [vmem:[%s4733_s9 + $0x418] sm:$0xff]  ;;  %v2245_v11 = vadd.f32 %v2237_v60, %v2180_v59  ;;  %v2242_v63 = vadd.f32 %v2234_v62, %v2177_v48 }
 0x11e   : > { %3340 = vmatmul.mubr.f32.gmra.mxu1 %v2033_v10  ;;  %3356 = vmatprep.subr.mxu0 %v2767_v12  ;;  %v2747_v10 = vld [vmem:[%s3936_s11 + $0x81] sm:$0xff]  ;;  %s2779_s11 = sshll.u32 %s3613_s17, 10  ;;  %s4684_s17 = scalar_lea.sflag [#allocation3], %s395_s25 }
 0x11f   : > { %3396 = vmatprep.subr.mxu1 %v2767_v12  ;;  %3357 = vmatpush3.msra.mxu0 %v2767_v12  ;;  %v2183_v21 = vmul.f32 %v4376_v57, %v2747_v10  ;;  %v2253_v20 = vmax.f32 %v2245_v11, 0.0  ;;  %v2250_v29 = vmax.f32 %v2242_v63, 0.0  ;;  %s4678_s26 = scalar_lea.hbm %s4734_s10, %s2779_s11 }
 0x120   : > { %3412 = vmatpush3.msra.mxu1 %v2767_v12  ;;  %3358 = vmatprep.subr.mxu0 %v2766_v19  ;;  %v2211_v12 = vpop.permute.xlu0 %2210 }
 0x121   : > { %3397 = vmatprep.subr.mxu1 %v2766_v19  ;;  %3359 = vmatpush3.msra.mxu0 %v2766_v19  ;;  %v2236_v24 = vmul.f32 %v4400_v9, %v2211_v12 }
 0x122   : > { %3413 = vmatpush3.msra.mxu1 %v2766_v19  ;;  %3298 = vmatprep.mubr.f32.mxu0 %v1814_v14  ;;  %v2231_v19 = vpop.permute.xlu1 %2230  ;;  %v2249_v14 = vmax.f32 %v2241_v6, 0.0 }
 0x123   : > { %3342 = vmatprep.mubr.f32.mxu1 %v2034_v23  ;;  %3360 = vmatprep.subr.mxu0 %v2765_v26  ;;  %v2179_v23 = vmul.f32 %v4376_v57, %v2743_v13 }
 0x124   : > { %3398 = vmatprep.subr.mxu1 %v2765_v26  ;;  %3361 = vmatpush3.msra.mxu0 %v2765_v26 }
 0x125   : > { %3414 = vmatpush3.msra.mxu1 %v2765_v26  ;;  %3362 = vmatprep.subr.mxu0 %v2764_v31  ;;  %v2240_v26 = vmul.f32 %v4400_v9, %v2231_v19  ;;  %v2244_v57 = vadd.f32 %v2236_v24, %v2179_v23 }
 0x126   : > { %3399 = vmatprep.subr.mxu1 %v2764_v31  ;;  %3363 = vmatpush3.msra.mxu0 %v2764_v31 }
 0x127   : > { %3415 = vmatpush3.msra.mxu1 %v2764_v31  ;;  %3299 = vmatmul.mubr.f32.gmra.mxu0 %v1815_v35  ;;  %v2251_v31 = vmax.f32 %v2243_v17, 0.0  ;;  %v2248_v0 = vadd.f32 %v2240_v26, %v2183_v21  ;;  %v2255_v35 = vmax.f32 %v2247_v27, 0.0  ;;  %v2252_v9 = vmax.f32 %v2244_v57, 0.0 }
 0x128   : > { %3343 = vmatmul.mubr.f32.gmra.mxu1 %v2035_v32  ;;  %3364 = vmatprep.subr.mxu0 %v2763_v41 }
 0x129   : > { %3400 = vmatprep.subr.mxu1 %v2763_v41  ;;  %3365 = vmatpush3.msra.mxu0 %v2763_v41  ;;  %v2256_v37 = vmax.f32 %v2248_v0, 0.0 }
 0x12a   : > { %3416 = vmatpush3.msra.mxu1 %v2763_v41  ;;  %3366 = vmatprep.subr.mxu0 %v2762_v46 }
 0x12b   : > { %3401 = vmatprep.subr.mxu1 %v2762_v46  ;;  %3367 = vmatpush3.msra.mxu0 %v2762_v46 }
 0x12c   : > { %3417 = vmatpush3.msra.mxu1 %v2762_v46  ;;  %3301 = vmatprep.mubr.f32.mxu0 %v1816_v50 }
 0x12d   : > { %3345 = vmatprep.mubr.f32.mxu1 %v2036_v49  ;;  %3368 = vmatprep.subr.mxu0 %v2761_v55 }
 0x12e   : > { %3402 = vmatprep.subr.mxu1 %v2761_v55  ;;  %3369 = vmatpush3.msra.mxu0 %v2761_v55 }
 0x12f   : > { %3418 = vmatpush3.msra.mxu1 %v2761_v55  ;;  %3370 = vmatprep.subr.mxu0 %v2760_v1 }
 0x130   : > { %3403 = vmatprep.subr.mxu1 %v2760_v1  ;;  %3371 = vmatpush3.msra.mxu0 %v2760_v1 }
 0x131   : > { %3419 = vmatpush3.msra.mxu1 %v2760_v1  ;;  %3302 = vmatmul.mubr.f32.gmra.mxu0 %v1817_v3 }
 0x132   : > { %3346 = vmatmul.mubr.f32.gmra.mxu1 %v2037_v36  ;;  %3372 = vmatprep.subr.mxu0 %v2759_v7 }
 0x133   : > { %3404 = vmatprep.subr.mxu1 %v2759_v7  ;;  %3373 = vmatpush3.msra.mxu0 %v2759_v7 }
 0x134   : > { %3420 = vmatpush3.msra.mxu1 %v2759_v7  ;;  %3374 = vmatprep.subr.mxu0 %v2758_v15 }
 0x135   : > { %3405 = vmatprep.subr.mxu1 %v2758_v15  ;;  %3375 = vmatpush3.msra.mxu0 %v2758_v15 }
 0x136   : > { %3421 = vmatpush3.msra.mxu1 %v2758_v15  ;;  %3376 = vmatprep.subr.mxu0 %v2757_v22 }
 0x137   : > { %3406 = vmatprep.subr.mxu1 %v2757_v22  ;;  %3380 = vmatprep.mubr.f32.mxu0 %v2249_v14 }
 0x138   : > { %3386 = vmatprep.mubr.f32.mxu1 %v2253_v20  ;;  %3377 = vmatpush3.msra.mxu0 %v2757_v22 }
 0x139   : > { %3422 = vmatpush3.msra.mxu1 %v2757_v22  ;;  %3378 = vmatprep.subr.mxu0 %v2756_v28 }
 0x13a   : > { %3407 = vmatprep.subr.mxu1 %v2756_v28  ;;  %3379 = vmatpush3.msra.mxu0 %v2756_v28 }
 0x13b   : > { %3423 = vmatpush3.msra.mxu1 %v2756_v28  ;;  %3381 = vmatmul.mubr.f32.vlgmr.msra.gmra.mxu0 %v2250_v29 }
 0x13c   : > { %3387 = vmatmul.mubr.f32.vlgmr.msra.gmra.mxu1 %v2254_v30  ;;  %3383 = vmatprep.mubr.f32.mxu0 %v2251_v31 }
 0x13d   : > { %3389 = vmatprep.mubr.f32.mxu1 %v2255_v35 }
 0x13f   : > { %3384 = vmatmul.mubr.f32.gmra.mxu0 %v2252_v9 }
 0x140   : > { %3390 = vmatmul.mubr.f32.gmra.mxu1 %v2256_v37 }
 0x158   : > { %v3074_v39 = vpop.f32.mrf.mxu1 }
 0x15a   : > { %v813_v34 = vpop.f32.mrf.mxu1 }
 0x15c   : > { %v3030_v32 = vpop.f32.mrf.mxu0 }
 0x15d   : > { %v819_v25 = vadd.f32 %v3074_v39, %v3030_v32 }
 0x15e   : > { %v708_v40 = vpop.f32.mrf.mxu0 }
 0x15f   : > { %v814_v28 = vadd.f32 %v813_v34, %v708_v40 }
 0x165   : > { %v3033_v41 = vpop.f32.mrf.mxu0 }
 0x166   : > { %v3077_v42 = vpop.f32.mrf.mxu1 }
 0x167   : > { %v718_v38 = vpop.f32.mrf.mxu0  ;;  %v829_v0 = vadd.f32 %v3077_v42, %v3033_v41 }
 0x168   : > { %v823_v43 = vpop.f32.mrf.mxu1 }
 0x16f   : > { %v3036_v44 = vpop.f32.mrf.mxu0 }
 0x170   : > { %v3080_v45 = vpop.f32.mrf.mxu1 }
 0x171   : > { %v728_v46 = vpop.f32.mrf.mxu0  ;;  %v839_v26 = vadd.f32 %v3080_v45, %v3036_v44 }
 0x172   : > { %v833_v50 = vpop.f32.mrf.mxu1 }
 0x173   : > { %v834_v30 = vadd.f32 %v833_v50, %v728_v46 }
 0x179   : > { %v3039_v51 = vpop.f32.mrf.mxu0 }
 0x17a   : > { %v3083_v49 = vpop.f32.mrf.mxu1 }
 0x17b   : > { %v738_v52 = vpop.f32.mrf.mxu0  ;;  %v849_v9 = vadd.f32 %v3083_v49, %v3039_v51 }
 0x17c   : > { %v843_v54 = vpop.f32.mrf.mxu1 }
 0x17d   : > { %v844_v44 = vadd.f32 %v843_v54, %v738_v52 }
 0x183   : > { %v3118_v55 = vpop.f32.mrf.mxu0 }
 0x184   : > { %v3162_v47 = vpop.f32.mrf.mxu1  ;;  %v1064_v29 = vadd.f32 %v3118_v55, %v819_v25 }
 0x185   : > { %v1024_v53 = vpop.f32.mrf.mxu0 }
 0x186   : > { %v1243_v58 = vpop.f32.mrf.mxu1  ;;  %v1063_v35 = vadd.f32 %v1024_v53, %v814_v28  ;;  %v1283_v32 = vadd.f32 %v3162_v47, %v1064_v29 }
 0x188   : > { %v1282_v25 = vadd.f32 %v1243_v58, %v1063_v35 }
 0x18d   : > { %v3121_v33 = vpop.f32.mrf.mxu0 }
 0x18e   : > { %v3165_v56 = vpop.f32.mrf.mxu1  ;;  %v1066_v39 = vadd.f32 %v3121_v33, %v829_v0 }
 0x18f   : > { %v1034_v59 = vpop.f32.mrf.mxu0 }
 0x190   : > { %v1253_v60 = vpop.f32.mrf.mxu1  ;;  %v1285_v42 = vadd.f32 %v3165_v56, %v1066_v39 }
 0x197   : > { %v3124_v1 = vpop.f32.mrf.mxu0 }
 0x198   : > { %v3168_v2 = vpop.f32.mrf.mxu1  ;;  %v1068_v31 = vadd.f32 %v3124_v1, %v839_v26 }
 0x199   : > { %v1044_v3 = vpop.f32.mrf.mxu0 }
 0x19a   : > { %v1263_v36 = vpop.f32.mrf.mxu1  ;;  %v1067_v37 = vadd.f32 %v1044_v3, %v834_v30  ;;  %v1287_v45 = vadd.f32 %v3168_v2, %v1068_v31 }
 0x19c   : > { %v1286_v50 = vadd.f32 %v1263_v36, %v1067_v37 }
 0x1a1   : > { %v3127_v5 = vpop.f32.mrf.mxu0 }
 0x1a2   : > { %v3171_v48 = vpop.f32.mrf.mxu1  ;;  %v1070_v34 = vadd.f32 %v3127_v5, %v849_v9 }
 0x1a3   : > { %v1054_v6 = vpop.f32.mrf.mxu0 }
 0x1a4   : > { %v1273_v7 = vpop.f32.mrf.mxu1  ;;  %v1069_v1 = vadd.f32 %v1054_v6, %v844_v44  ;;  %v1289_v49 = vadd.f32 %v3171_v48, %v1070_v34 }
 0x1a6   : > { %v1288_v52 = vadd.f32 %v1273_v7, %v1069_v1 }
 0x1ab   : > { %v3206_v62 = vpop.f32.mrf.mxu0 }
 0x1ac   : > { %v3250_v8 = vpop.f32.mrf.mxu1 }
 0x1ad   : > { %v1462_v10 = vpop.f32.mrf.mxu0 }
 0x1ae   : > { %v1681_v11 = vpop.f32.mrf.mxu1  ;;  %v1501_v51 = vadd.f32 %v1462_v10, %v1282_v25 }
 0x1b0   : > { %v1720_v58 = vadd.f32 %v1681_v11, %v1501_v51 }
 0x1b5   : > { %v3209_v61 = vpop.f32.mrf.mxu0 }
 0x1b6   : > { %v4650_v4 = vpop.f32.mrf.mxu1  ;;  %v1504_v33 = vadd.f32 %v3209_v61, %v1285_v42 }
 0x1b7   : > { %4737 = vst [vmem:[#allocation5_spill] sm:$0xff] %v4650_v4  ;;  %v1472_v12 = vpop.f32.mrf.mxu0  ;;  %v824_v4 = vadd.f32 %v823_v43, %v718_v38 }
 0x1b8   : > { %v4652_v13 = vpop.f32.mrf.mxu1 }
 0x1b9   : > { %4738 = vst [vmem:[#allocation6_spill] sm:$0xff] %v4652_v13  ;;  %v1065_v55 = vadd.f32 %v1034_v59, %v824_v4 }
 0x1bb   : > { %v1284_v43 = vadd.f32 %v1253_v60, %v1065_v55 }
 0x1bd   : > { %v1503_v59 = vadd.f32 %v1472_v12, %v1284_v43 }
 0x1be   : > { %v4741_v10 = vld [vmem:[#allocation5_spill] sm:$0xff] }
 0x1bf   : > { %v3212_v15 = vpop.f32.mrf.mxu0  ;;  %v1723_v48 = vadd.f32 %v4741_v10, %v1504_v33 }
 0x1c0   : > { %v3256_v16 = vpop.f32.mrf.mxu1  ;;  %v1506_v41 = vadd.f32 %v3212_v15, %v1287_v45  ;;  %v4742_v61 = vld [vmem:[#allocation6_spill] sm:$0xff] }
 0x1c1   : > { %v1482_v18 = vpop.f32.mrf.mxu0  ;;  %v1722_v26 = vadd.f32 %v4742_v61, %v1503_v59 }
 0x1c2   : > { %v1701_v19 = vpop.f32.mrf.mxu1  ;;  %v1505_v53 = vadd.f32 %v1482_v18, %v1286_v50  ;;  %v1725_v54 = vadd.f32 %v3256_v16, %v1506_v41 }
 0x1c4   : > { %v1724_v36 = vadd.f32 %v1701_v19, %v1505_v53  ;;  %v2772_v19 = vld [vmem:[%s4726_s2] ss:$0 sm:$0xff] }
 0x1c9   : > { %v3215_v21 = vpop.f32.mrf.mxu0 }
 0x1ca   : > { %v3259_v14 = vpop.f32.mrf.mxu1  ;;  %v1508_v2 = vadd.f32 %v3215_v21, %v1289_v49 }
 0x1cb   : > { %v1492_v63 = vpop.f32.mrf.mxu0 }
 0x1cc   : > { %v1711_v22 = vpop.f32.mrf.mxu1  ;;  %v1507_v6 = vadd.f32 %v1492_v63, %v1288_v52  ;;  %v1727_v18 = vadd.f32 %v3259_v14, %v1508_v2 }
 0x1ce   : > { %v1726_v28 = vadd.f32 %v1711_v22, %v1507_v6  ;;  %v2773_v22 = vld [vmem:[%s4727_s3] ss:$0 sm:$0xff] }
 0x1d3   : > { %v3294_v23 = vpop.f32.mrf.mxu0 }
 0x1d4   : > { %v3338_v24 = vpop.f32.mrf.mxu1 }
 0x1d5   : > { %v1901_v20 = vpop.f32.mrf.mxu0 }
 0x1d6   : > { %v4654_v17 = vpop.f32.mrf.mxu1  ;;  %v1940_v15 = vadd.f32 %v1901_v20, %v1720_v58 }
 0x1d7   : > { %4739 = vst [vmem:[#allocation7_spill] sm:$0xff] %v4654_v17 }
 0x1dd   : > { %v3297_v27 = vpop.f32.mrf.mxu0 }
 0x1de   : > { %v4656_v57 = vpop.f32.mrf.mxu1  ;;  %v1943_v16 = vadd.f32 %v3297_v27, %v1723_v48  ;;  %v4743_v63 = vld [vmem:[#allocation7_spill] sm:$0xff] }
 0x1df   : > { %4740 = vst [vmem:[#allocation8_spill] sm:$0xff] %v4656_v57  ;;  %v1911_v13 = vpop.f32.mrf.mxu0  ;;  %v1502_v57 = vadd.f32 %v3206_v62, %v1283_v32  ;;  %v2160_v20 = vadd.f32 %v4743_v63, %v1940_v15 }
 0x1e0   : > { %v4658_v17 = vpop.f32.mrf.mxu1  ;;  %v1942_v14 = vadd.f32 %v1911_v13, %v1722_v26 }
 0x1e1   : > { %v1721_v47 = vadd.f32 %v3250_v8, %v1502_v57 }
 0x1e2   : > { %v2162_v34 = vadd.f32 %v4658_v17, %v1942_v14 }
 0x1e3   : > { %v1941_v62 = vadd.f32 %v3294_v23, %v1721_v47 }
 0x1e5   : > { %v2161_v7 = vadd.f32 %v3338_v24, %v1941_v62 }
 0x1e6   : > { %v4744_v0 = vld [vmem:[#allocation8_spill] sm:$0xff] }
 0x1e7   : > { %v3300_v40 = vpop.f32.mrf.mxu0  ;;  %v2163_v35 = vadd.f32 %v4744_v0, %v1943_v16 }
 0x1e8   : > { %v3344_v46 = vpop.f32.mrf.mxu1  ;;  %v1945_v56 = vadd.f32 %v3300_v40, %v1725_v54 }
 0x1e9   : > { %v1921_v38 = vpop.f32.mrf.mxu0 }
 0x1ea   : > { %v2141_v3 = vpop.f32.mrf.mxu1  ;;  %v1944_v60 = vadd.f32 %v1921_v38, %v1724_v36  ;;  %v2165_v11 = vadd.f32 %v3344_v46, %v1945_v56 }
 0x1ec   : > { %v2164_v30 = vadd.f32 %v2141_v3, %v1944_v60 }
 0x1f1   : > { %v3303_v5 = vpop.f32.mrf.mxu0 }
 0x1f2   : > { %v3347_v4 = vpop.f32.mrf.mxu1  ;;  %v1947_v12 = vadd.f32 %v3303_v5, %v1727_v18 }
 0x1f3   : > { %v1931_v8 = vpop.f32.mrf.mxu0 }
 0x1f4   : > { %v2151_v21 = vpop.f32.mrf.mxu1  ;;  %v1946_v31 = vadd.f32 %v1931_v8, %v1726_v28  ;;  %v2167_v39 = vadd.f32 %v3347_v4, %v1947_v12 }
 0x1f6   : > { %v2166_v50 = vadd.f32 %v2151_v21, %v1946_v31 }
 0x1fb   : > { %v3382_v23 = vpop.f32.mrf.mxu0 }
 0x1fc   : > { %v2380_v29 = vadd.f32 %v3382_v23, %v2161_v7  ;;  %v3388_v57 = vpop.f32.mrf.mxu1 }
 0x1fd   : > { %v2384_v24 = vadd.f32 %v3388_v57, %v2165_v11  ;;  %v2340_v27 = vpop.f32.mrf.mxu0 }
 0x1fe   : > { %v2395_v9 = vmul.f32 %v2772_v19, %v2380_v29  ;;  %v2379_v37 = vadd.f32 %v2340_v27, %v2160_v20  ;;  %v2360_v32 = vpop.f32.mrf.mxu1 }
 0x1ff   : > { %v2399_v44 = vmul.f32 %v2772_v19, %v2384_v24  ;;  %v2383_v13 = vadd.f32 %v2360_v32, %v2164_v30  ;;  %v3385_v45 = vpop.f32.mrf.mxu0 }
 0x200   : > { %v2410_v40 = vadd.f32 %v2773_v22, %v2395_v9  ;;  %v2394_v25 = vmul.f32 %v2772_v19, %v2379_v37  ;;  %v2382_v55 = vadd.f32 %v3385_v45, %v2163_v35  ;;  %v3391_v46 = vpop.f32.mrf.mxu1 }
 0x201   : > { %v2414_v1 = vadd.f32 %v2773_v22, %v2399_v44  ;;  %v2398_v41 = vmul.f32 %v2772_v19, %v2383_v13  ;;  %v2386_v42 = vadd.f32 %v3391_v46, %v2167_v39  ;;  %v2350_v51 = vpop.f32.mrf.mxu0 }
 0x202   : > { %v2418_v49 = vmax.f32 %v2410_v40, 0.0  ;;  %v2409_v53 = vadd.f32 %v2773_v22, %v2394_v25  ;;  %v2397_v38 = vmul.f32 %v2772_v19, %v2382_v55  ;;  %v2381_v43 = vadd.f32 %v2350_v51, %v2162_v34  ;;  %v2370_v47 = vpop.f32.mrf.mxu1 }
 0x203   : > { %v2422_v33 = vmax.f32 %v2414_v1, 0.0  ;;  %v2413_v3 = vadd.f32 %v2773_v22, %v2398_v41  ;;  %v2401_v52 = vmul.f32 %v2772_v19, %v2386_v42  ;;  %v2385_v54 = vadd.f32 %v2370_v47, %v2166_v50 }
 0x204   : > { %2426 = vst [vmem:[%s397_s28 + $0x8] sm:$0xff] %v2418_v49  ;;  %v2417_v17 = vmax.f32 %v2409_v53, 0.0  ;;  %v2412_v2 = vadd.f32 %v2773_v22, %v2397_v38  ;;  %v2396_v5 = vmul.f32 %v2772_v19, %v2381_v43 }
 0x205   : > { %2430 = vst [vmem:[%s397_s28 + $0x28] sm:$0xff] %v2422_v33  ;;  %v2421_v58 = vmax.f32 %v2413_v3, 0.0  ;;  %v2416_v59 = vadd.f32 %v2773_v22, %v2401_v52  ;;  %v2400_v62 = vmul.f32 %v2772_v19, %v2385_v54 }
 0x206   : > { %2425 = vst [vmem:[%s397_s28] sm:$0xff] %v2417_v17  ;;  %v2420_v4 = vmax.f32 %v2412_v2, 0.0  ;;  %v2411_v36 = vadd.f32 %v2773_v22, %v2396_v5 }
 0x207   : > { %2429 = vst [vmem:[%s397_s28 + $0x20] sm:$0xff] %v2421_v58  ;;  %v2424_v6 = vmax.f32 %v2416_v59, 0.0  ;;  %v2415_v56 = vadd.f32 %v2773_v22, %v2400_v62 }
 0x208   : > { %2428 = vst [vmem:[%s397_s28 + $0x18] sm:$0xff] %v2420_v4  ;;  %v2419_v10 = vmax.f32 %v2411_v36, 0.0 }
 0x209   : > { %2432 = vst [vmem:[%s397_s28 + $0x38] sm:$0xff] %v2424_v6  ;;  %v2423_v48 = vmax.f32 %v2415_v56, 0.0 }
 0x20a   : > { %2427 = vst [vmem:[%s397_s28 + $0x10] sm:$0xff] %v2419_v10 }
 0x20b   : > { %2431 = vst [vmem:[%s397_s28 + $0x30] sm:$0xff] %v2423_v48 }
 0x20c   : > { %3484 = shalt.err (!%p3481_p3)
}
 0x20d   : > { %s3485_s25 = scalar_lea.hbm %s4678_s26, 1024  ;;  %s3489_s29 = scalar_lea.hbm %s4734_s10, 2048 }
 0x20e   : > { %p3486_p4 = scmp.ne.s32.totalorder %s4678_s26, %s3485_s25  ;;  %p3490_p9 = scmp.lt.s32.totalorder %s4678_s26, %s4734_s10 }
 0x20f   : > { %p3491_p10 = scmp.lt.s32.totalorder %s3489_s29, %s3485_s25 }
 0x210   : > { %p3487_p7 = pnand %p3486_p4, %p3630_p5 }
 0x211   : > { %p3492_p11 = por %p3491_p10, %p3490_p9 }
 0x212   : > { %p3488_p8 = pneg %p3487_p7 }
 0x214   : > { %p3493_p12 = pnand %p3492_p11, %p3488_p8 }
 0x216   : > { %3496 = shalt.err (!%p3493_p12)
}
 0x217   : > { %s3535_s18 = smov 128   ;;  %s3536_s12 = smov 8  }
 0x218   : > { %3425 = dma.vmem_to_hbm [thread:$0]  (%p3630_p5), %s4680_s30, 1024, %s4678_s26, %s4684_s17, %s3535_s18, %s3535_s18, %s3536_s12  }
 0x219 PF: > { %p3431_p13 = scmp.ge.s32.totalorder %s3531_s16, 2  ;;  %s2462_s20 = sand.u32 1, %s3519_s13  }
 0x21a   : > { %s2463_s25 = scalar_lea.sflag [#allocation3], %s2462_s20 }
 0x21b   : > { %p3428_p0 = pnand %p3431_p13, %p3634_p6 }
 0x21d   : > { %p3429_p1 = pneg %p3428_p0 }
 0x21f   : > { %3514 = dma.done.wait (%p3429_p1), %s2463_s25, 1024  }
 0x220   : > { %3516 = vsyncadd (%p3429_p1), %s2463_s25, 4294966272  ;;  %p20_p2 = scmp.ge.s32.totalorder %s3617_s19, 4   ;;  %s4745_s13 = smov %s3523_s14 }
 0x221   : > { %s4746_s14 = smov %s3527_s15  ;;  %s4747_s15 = smov %s3628_s22 }
 0x222   : > { %s4748_s16 = smov %s3617_s19  ;;  %22 = sbr.rel (!%p20_p2) target bundleno = 3 (0x3), region = 122 }
 0x227   :  { %2468 = vsyncpa [#allocation3], 1 }
 0x228   :  { %2470 = vsyncpa [#allocation3 + $0x1], 1 }

</bundles_post_ra>
